<compile_context>
chip_gen: v7x
topology: tpu7x:2x2x1
jax: 0.10.0
libtpu: 0.0.40
codegen_flags: <defaults>
</compile_context>

<pallas_src>
import math

import jax
import jax.numpy as jnp
from jax.experimental import pallas as pl
from jax.experimental.pallas import tpu as pltpu

HIDDEN = 32          # pars['layers'] = [HIDDEN, HIDDEN]
IN_DIM = 3
OUT_DIM = 2
ALPHA = 26.4
PI = math.pi


def _mlp_kernel(x_ref, w0_ref, wh_ref, w2_ref, b_ref, out_ref):
    # x: (3, TN) with batch on lanes
    x = x_ref[...]

    # weights, transposed to (out, in); the three 32x32 blocks share one slab
    w0 = w0_ref[...]                             # (32, 3)
    wr0 = wh_ref[0:HIDDEN, :]                    # (32, 32)
    w1 = wh_ref[HIDDEN:2 * HIDDEN, :]            # (32, 32)
    wr1 = wh_ref[2 * HIDDEN:3 * HIDDEN, :]       # (32, 32)
    w2 = w2_ref[...]                             # (2, 32)
    b0 = b_ref[:, 0:1]                           # (32, 1) -> lane-broadcast
    br0 = b_ref[:, 1:2]
    b1 = b_ref[:, 2:3]
    br1 = b_ref[:, 3:4]
    b2 = b_ref[0:OUT_DIM, 4:5]                   # (2, 1)

    # --- neural network branch: 5 MXU matmuls, all activations (32, TN) lane-dense ---
    h = jnp.dot(w0, x, preferred_element_type=jnp.float32) + b0
    h = h + jnp.tanh(
        jnp.dot(wr0, jnp.tanh(h), preferred_element_type=jnp.float32) + br0)
    h = jnp.dot(w1, h, preferred_element_type=jnp.float32) + b1
    h = h + jnp.tanh(
        jnp.dot(wr1, jnp.tanh(h), preferred_element_type=jnp.float32) + br1)
    yn = jnp.dot(w2, h, preferred_element_type=jnp.float32) + b2        # (2, TN)

    # --- analytic branches (all rows are full-lane-width) ---
    t = x[0:1, :]                                # (1, TN)
    xy = x[1:3, :]                               # (2, TN): rows = [x, y]

    s2 = jnp.sin(2.0 * PI * xy)                  # [sin 2πx ; sin 2πy]
    s1 = jnp.sin(PI * xy)                        # [sin  πx ; sin  πy]
    u = s2[0:1, :] * s2[1:2, :]                  # particular solution, row 0
    v = s1[0:1, :] * s1[1:2, :]                  # particular solution, row 1
    yp = jnp.concatenate([u, v], axis=0)         # (2, TN)

    xx = xy[0:1, :]
    yy = xy[1:2, :]
    d = (jnp.tanh(ALPHA * t)
         * (4.0 * xx * (1.0 - xx))
         * (4.0 * yy * (1.0 - yy)))              # (1, TN), broadcasts over both rows

    # single full-tile, lane-dense store
    out_ref[...] = d * yn + (1.0 - d) * yp


def mlp_forward(X, params, *, tile_n=1024):
    """X: (N, 3) float32. params: [w0,b0,wr0,br0,w1,b1,wr1,br1,w2,b2] with
    weights stored as (in, out) and biases as (1, out) (PyTorch-equivalent)."""
    w0, b0, wr0, br0, w1, b1, wr1, br1, w2, b2 = params
    N = X.shape[0]

    # batch sits on lanes -> tile must be a multiple of 128; cap it so tiny batches
    # don't over-pad. (For v7x prefer N large enough that n_pad // tile_n >= 2 so both
    # TensorCores get grid steps.)
    tile_n = max(128, min(int(tile_n), pl.cdiv(N, 128) * 128))
    n_pad = pl.cdiv(N, tile_n) * tile_n
    grid = (n_pad // tile_n,)

    # lane-dense (3, N) input, zero-padded columns (bounded math, sliced off below)
    xt = jnp.zeros((IN_DIM, n_pad), jnp.float32).at[:, :N].set(X.T)

    # transposed weights + packed slabs
    w0t = w0.T                                                   # (32, 3)
    whslab = jnp.concatenate([wr0.T, w1.T, wr1.T], axis=0)       # (96, 32)
    w2t = w2.T                                                   # (2, 32)
    b2col = jnp.zeros((HIDDEN, 1), jnp.float32).at[:OUT_DIM, :].set(b2.T)
    bslab = jnp.concatenate([b0.T, br0.T, b1.T, br1.T, b2col], axis=1)   # (32, 5)

    weight_bytes = 4 * (w0t.size + whslab.size + w2t.size + bslab.size)
    cost = pl.CostEstimate(
        flops=2 * n_pad * (IN_DIM * HIDDEN + 3 * HIDDEN * HIDDEN + HIDDEN * OUT_DIM),
        transcendentals=n_pad * (4 * HIDDEN + 5),
        bytes_accessed=4 * n_pad * (IN_DIM + OUT_DIM) + weight_bytes,
    )

    out_t = pl.pallas_call(
        _mlp_kernel,
        out_shape=jax.ShapeDtypeStruct((OUT_DIM, n_pad), jnp.float32),
        grid=grid,
        in_specs=[
            pl.BlockSpec((IN_DIM, tile_n), lambda i: (0, i)),
            pl.BlockSpec(w0t.shape, lambda i: (0, 0)),     # VMEM-resident weights
            pl.BlockSpec(whslab.shape, lambda i: (0, 0)),
            pl.BlockSpec(w2t.shape, lambda i: (0, 0)),
            pl.BlockSpec(bslab.shape, lambda i: (0, 0)),
        ],
        out_specs=pl.BlockSpec((OUT_DIM, tile_n), lambda i: (0, i)),
        compiler_params=pltpu.CompilerParams(
            dimension_semantics=("parallel",)),
        cost_estimate=cost,
    )(xt, w0t, whslab, w2t, bslab)

    # back to the module's (N, 2) row layout, dropping padding
    return out_t[:, :N].T


def init_params(key):
    """Deterministic params matching the PyTorch module's shapes.
    Linear weights stored as (in, out); biases as (1, out)."""
    layers = [IN_DIM, HIDDEN, HIDDEN, OUT_DIM]
    params = []
    for fan_in, fan_out in zip(layers[:-1], layers[1:]):
        bound = 1.0 / math.sqrt(fan_in)
        key, kw, kb = jax.random.split(key, 3)
        w = jax.random.uniform(kw, (fan_in, fan_out), jnp.float32, -bound, bound)
        b = jax.random.uniform(kb, (1, fan_out), jnp.float32, -bound, bound)
        params.append((w, b))
        if fan_out != OUT_DIM:  # ResidualBlock after every Linear except the last
            key, krw, krb = jax.random.split(key, 3)
            rbound = 1.0 / math.sqrt(fan_out)
            rw = jax.random.uniform(krw, (fan_out, fan_out), jnp.float32, -rbound, rbound)
            rb = jax.random.uniform(krb, (1, fan_out), jnp.float32, -rbound, rbound)
            params.append((rw, rb))
    flat = []  # [w0, b0, wr0, br0, w1, b1, wr1, br1, w2, b2]
    for w, b in params:
        flat.extend([w, b])
    return flat


def reference_forward(X, params):
    """Pure-JAX reference for correctness checking."""
    w0, b0, wr0, br0, w1, b1, wr1, br1, w2, b2 = params
    h = X @ w0 + b0
    h = h + jnp.tanh(jnp.tanh(h) @ wr0 + br0)
    h = h @ w1 + b1
    h = h + jnp.tanh(jnp.tanh(h) @ wr1 + br1)
    yn = h @ w2 + b2
    t, x, y = X[:, 0:1], X[:, 1:2], X[:, 2:3]
    yp = jnp.concatenate([jnp.sin(2 * PI * x) * jnp.sin(2 * PI * y),
                          jnp.sin(PI * x) * jnp.sin(PI * y)], axis=1)
    d = jnp.tanh(t * ALPHA) * (4 * x * (1 - x)) * (4 * y * (1 - y))
    D = jnp.concatenate([d, d], axis=1)
    return D * yn + (1 - D) * yp


if __name__ == "__main__":
    key = jax.random.PRNGKey(0)
    key, kx = jax.random.split(key)

    # batch of collocation points (t, x, y); N chosen so the default tile gives
    # 2 grid steps and exercises the padding/slicing path (2000 -> padded to 2048).
    N = 2000
    X = jax.random.uniform(kx, (N, IN_DIM), jnp.float32)

    params = init_params(key)

    out = mlp_forward(X, params)           # default tile_n=1024
    out = jax.block_until_ready(out)

    ref = reference_forward(X, params)
    assert out.shape == (N, OUT_DIM)
    assert jnp.allclose(out, ref, atol=5e-5, rtol=5e-5), "Pallas output mismatch vs reference"

    print("KERNEL_OK")
</pallas_src>

<mosaic_0001>
module attributes {stable_mosaic.version = 11 : i64} {
  func.func @_mlp_kernel(%arg0: i32, %arg1: memref<3x1024xf32, #tpu.memory_space<vmem>>, %arg2: memref<32x3xf32, #tpu.memory_space<vmem>>, %arg3: memref<96x32xf32, #tpu.memory_space<vmem>>, %arg4: memref<2x32xf32, #tpu.memory_space<vmem>>, %arg5: memref<32x5xf32, #tpu.memory_space<vmem>>, %arg6: memref<2x1024xf32, #tpu.memory_space<vmem>>) attributes {dimension_semantics = [#tpu.dimension_semantics<parallel>], iteration_bounds = array<i64: 2>, scalar_prefetch = 0 : i64, scratch_operands = 0 : i64, tpu.core_type = #tpu.core_type<tc>, window_params = [{transform_indices = @transform_0, window_bounds = array<i64: 3, 1024>}, {pipeline_mode = #tpu.pipeline_mode<synchronous>, transform_indices = @transform_1, window_bounds = array<i64: 32, 3>}, {pipeline_mode = #tpu.pipeline_mode<synchronous>, transform_indices = @transform_2, window_bounds = array<i64: 96, 32>}, {pipeline_mode = #tpu.pipeline_mode<synchronous>, transform_indices = @transform_3, window_bounds = array<i64: 2, 32>}, {pipeline_mode = #tpu.pipeline_mode<synchronous>, transform_indices = @transform_4, window_bounds = array<i64: 32, 5>}, {transform_indices = @transform_5, window_bounds = array<i64: 2, 1024>}]} {
    %c0 = arith.constant 0 : index
    %c0_0 = arith.constant 0 : index
    %0 = vector.load %arg1[%c0, %c0_0] : memref<3x1024xf32, #tpu.memory_space<vmem>>, vector<3x1024xf32>
    %c0_1 = arith.constant 0 : index
    %c0_2 = arith.constant 0 : index
    %1 = vector.load %arg2[%c0_1, %c0_2] : memref<32x3xf32, #tpu.memory_space<vmem>>, vector<32x3xf32>
    %c0_3 = arith.constant 0 : index
    %c0_4 = arith.constant 0 : index
    %2 = vector.load %arg3[%c0_3, %c0_4] : memref<96x32xf32, #tpu.memory_space<vmem>>, vector<32x32xf32>
    %c32 = arith.constant 32 : index
    %c0_5 = arith.constant 0 : index
    %3 = vector.load %arg3[%c32, %c0_5] : memref<96x32xf32, #tpu.memory_space<vmem>>, vector<32x32xf32>
    %c64 = arith.constant 64 : index
    %c0_6 = arith.constant 0 : index
    %4 = vector.load %arg3[%c64, %c0_6] : memref<96x32xf32, #tpu.memory_space<vmem>>, vector<32x32xf32>
    %c0_7 = arith.constant 0 : index
    %c0_8 = arith.constant 0 : index
    %5 = vector.load %arg4[%c0_7, %c0_8] : memref<2x32xf32, #tpu.memory_space<vmem>>, vector<2x32xf32>
    %c0_9 = arith.constant 0 : index
    %c0_10 = arith.constant 0 : index
    %6 = vector.load %arg5[%c0_9, %c0_10] : memref<32x5xf32, #tpu.memory_space<vmem>>, vector<32x1xf32>
    %c0_11 = arith.constant 0 : index
    %c1 = arith.constant 1 : index
    %7 = vector.load %arg5[%c0_11, %c1] : memref<32x5xf32, #tpu.memory_space<vmem>>, vector<32x1xf32>
    %c0_12 = arith.constant 0 : index
    %c2 = arith.constant 2 : index
    %8 = vector.load %arg5[%c0_12, %c2] : memref<32x5xf32, #tpu.memory_space<vmem>>, vector<32x1xf32>
    %c0_13 = arith.constant 0 : index
    %c3 = arith.constant 3 : index
    %9 = vector.load %arg5[%c0_13, %c3] : memref<32x5xf32, #tpu.memory_space<vmem>>, vector<32x1xf32>
    %c0_14 = arith.constant 0 : index
    %c4 = arith.constant 4 : index
    %10 = vector.load %arg5[%c0_14, %c4] : memref<32x5xf32, #tpu.memory_space<vmem>>, vector<2x1xf32>
    %cst = arith.constant dense<0.000000e+00> : vector<32x1024xf32>
    %11 = tpu.matmul %1, %0, %cst {dimension_numbers = #tpu.dot_dimension_numbers<[1], [0], [0], [1], [0, 0, 1, 1], [], []>} : vector<32x3xf32>, vector<3x1024xf32>, vector<32x1024xf32> -> vector<32x1024xf32>
    %12 = vector.broadcast %6 : vector<32x1xf32> to vector<32x1024xf32>
    %13 = arith.addf %11, %12 : vector<32x1024xf32>
    %14 = math.tanh %13 : vector<32x1024xf32>
    %cst_15 = arith.constant dense<0.000000e+00> : vector<32x1024xf32>
    %15 = tpu.matmul %2, %14, %cst_15 {dimension_numbers = #tpu.dot_dimension_numbers<[1], [0], [0], [1], [0, 0, 1, 1], [], []>} : vector<32x32xf32>, vector<32x1024xf32>, vector<32x1024xf32> -> vector<32x1024xf32>
    %16 = vector.broadcast %7 : vector<32x1xf32> to vector<32x1024xf32>
    %17 = arith.addf %15, %16 : vector<32x1024xf32>
    %18 = math.tanh %17 : vector<32x1024xf32>
    %19 = arith.addf %13, %18 : vector<32x1024xf32>
    %cst_16 = arith.constant dense<0.000000e+00> : vector<32x1024xf32>
    %20 = tpu.matmul %3, %19, %cst_16 {dimension_numbers = #tpu.dot_dimension_numbers<[1], [0], [0], [1], [0, 0, 1, 1], [], []>} : vector<32x32xf32>, vector<32x1024xf32>, vector<32x1024xf32> -> vector<32x1024xf32>
    %21 = vector.broadcast %8 : vector<32x1xf32> to vector<32x1024xf32>
    %22 = arith.addf %20, %21 : vector<32x1024xf32>
    %23 = math.tanh %22 : vector<32x1024xf32>
    %cst_17 = arith.constant dense<0.000000e+00> : vector<32x1024xf32>
    %24 = tpu.matmul %4, %23, %cst_17 {dimension_numbers = #tpu.dot_dimension_numbers<[1], [0], [0], [1], [0, 0, 1, 1], [], []>} : vector<32x32xf32>, vector<32x1024xf32>, vector<32x1024xf32> -> vector<32x1024xf32>
    %25 = vector.broadcast %9 : vector<32x1xf32> to vector<32x1024xf32>
    %26 = arith.addf %24, %25 : vector<32x1024xf32>
    %27 = math.tanh %26 : vector<32x1024xf32>
    %28 = arith.addf %22, %27 : vector<32x1024xf32>
    %cst_18 = arith.constant dense<0.000000e+00> : vector<2x1024xf32>
    %29 = tpu.matmul %5, %28, %cst_18 {dimension_numbers = #tpu.dot_dimension_numbers<[1], [0], [0], [1], [0, 0, 1, 1], [], []>} : vector<2x32xf32>, vector<32x1024xf32>, vector<2x1024xf32> -> vector<2x1024xf32>
    %30 = vector.broadcast %10 : vector<2x1xf32> to vector<2x1024xf32>
    %31 = arith.addf %29, %30 : vector<2x1024xf32>
    %32 = vector.extract_strided_slice %0 {offsets = [0, 0], sizes = [1, 1024], strides = [1, 1]} : vector<3x1024xf32> to vector<1x1024xf32>
    %33 = vector.extract_strided_slice %0 {offsets = [1, 0], sizes = [2, 1024], strides = [1, 1]} : vector<3x1024xf32> to vector<2x1024xf32>
    %cst_19 = arith.constant 6.28318548 : f32
    %34 = vector.broadcast %cst_19 : f32 to vector<2x1024xf32>
    %35 = arith.mulf %34, %33 : vector<2x1024xf32>
    %36 = math.sin %35 : vector<2x1024xf32>
    %cst_20 = arith.constant 3.14159274 : f32
    %37 = vector.broadcast %cst_20 : f32 to vector<2x1024xf32>
    %38 = arith.mulf %37, %33 : vector<2x1024xf32>
    %39 = math.sin %38 : vector<2x1024xf32>
    %40 = vector.extract_strided_slice %36 {offsets = [0, 0], sizes = [1, 1024], strides = [1, 1]} : vector<2x1024xf32> to vector<1x1024xf32>
    %41 = vector.extract_strided_slice %36 {offsets = [1, 0], sizes = [1, 1024], strides = [1, 1]} : vector<2x1024xf32> to vector<1x1024xf32>
    %42 = arith.mulf %40, %41 : vector<1x1024xf32>
    %43 = vector.extract_strided_slice %39 {offsets = [0, 0], sizes = [1, 1024], strides = [1, 1]} : vector<2x1024xf32> to vector<1x1024xf32>
    %44 = vector.extract_strided_slice %39 {offsets = [1, 0], sizes = [1, 1024], strides = [1, 1]} : vector<2x1024xf32> to vector<1x1024xf32>
    %45 = arith.mulf %43, %44 : vector<1x1024xf32>
    %46 = tpu.concatenate %42, %45 in 0 : vector<1x1024xf32>, vector<1x1024xf32> -> vector<2x1024xf32>
    %47 = vector.extract_strided_slice %33 {offsets = [0, 0], sizes = [1, 1024], strides = [1, 1]} : vector<2x1024xf32> to vector<1x1024xf32>
    %48 = vector.extract_strided_slice %33 {offsets = [1, 0], sizes = [1, 1024], strides = [1, 1]} : vector<2x1024xf32> to vector<1x1024xf32>
    %cst_21 = arith.constant 2.640000e+01 : f32
    %49 = vector.broadcast %cst_21 : f32 to vector<1x1024xf32>
    %50 = arith.mulf %49, %32 : vector<1x1024xf32>
    %51 = math.tanh %50 : vector<1x1024xf32>
    %cst_22 = arith.constant 4.000000e+00 : f32
    %52 = vector.broadcast %cst_22 : f32 to vector<1x1024xf32>
    %53 = arith.mulf %52, %47 : vector<1x1024xf32>
    %cst_23 = arith.constant 1.000000e+00 : f32
    %54 = vector.broadcast %cst_23 : f32 to vector<1x1024xf32>
    %55 = arith.subf %54, %47 : vector<1x1024xf32>
    %56 = arith.mulf %53, %55 : vector<1x1024xf32>
    %57 = arith.mulf %51, %56 : vector<1x1024xf32>
    %cst_24 = arith.constant 4.000000e+00 : f32
    %58 = vector.broadcast %cst_24 : f32 to vector<1x1024xf32>
    %59 = arith.mulf %58, %48 : vector<1x1024xf32>
    %cst_25 = arith.constant 1.000000e+00 : f32
    %60 = vector.broadcast %cst_25 : f32 to vector<1x1024xf32>
    %61 = arith.subf %60, %48 : vector<1x1024xf32>
    %62 = arith.mulf %59, %61 : vector<1x1024xf32>
    %63 = arith.mulf %57, %62 : vector<1x1024xf32>
    %64 = vector.broadcast %63 : vector<1x1024xf32> to vector<2x1024xf32>
    %65 = arith.mulf %64, %31 : vector<2x1024xf32>
    %cst_26 = arith.constant 1.000000e+00 : f32
    %66 = vector.broadcast %cst_26 : f32 to vector<1x1024xf32>
    %67 = arith.subf %66, %63 : vector<1x1024xf32>
    %68 = vector.broadcast %67 : vector<1x1024xf32> to vector<2x1024xf32>
    %69 = arith.mulf %68, %46 : vector<2x1024xf32>
    %70 = arith.addf %65, %69 : vector<2x1024xf32>
    %c0_27 = arith.constant 0 : index
    %c0_28 = arith.constant 0 : index
    %71 = vector.load %arg6[%c0_27, %c0_28] : memref<2x1024xf32, #tpu.memory_space<vmem>>, vector<2x1024xf32>
    tpu.vector_store %arg6[%c0_27, %c0_28], %70 {strides = array<i32>} : memref<2x1024xf32, #tpu.memory_space<vmem>>, vector<2x1024xf32>,
    return
  }
  func.func @transform_0(%arg0: i32) -> (i32, i32) {
    %c0_i32 = arith.constant 0 : i32
    %c0_i32_0 = arith.constant 0 : i32
    return %c0_i32, %arg0 : i32, i32
  }
  func.func @transform_1(%arg0: i32) -> (i32, i32) {
    %c0_i32 = arith.constant 0 : i32
    %c0_i32_0 = arith.constant 0 : i32
    %c0_i32_1 = arith.constant 0 : i32
    return %c0_i32, %c0_i32_0 : i32, i32
  }
  func.func @transform_2(%arg0: i32) -> (i32, i32) {
    %c0_i32 = arith.constant 0 : i32
    %c0_i32_0 = arith.constant 0 : i32
    %c0_i32_1 = arith.constant 0 : i32
    return %c0_i32, %c0_i32_0 : i32, i32
  }
  func.func @transform_3(%arg0: i32) -> (i32, i32) {
    %c0_i32 = arith.constant 0 : i32
    %c0_i32_0 = arith.constant 0 : i32
    %c0_i32_1 = arith.constant 0 : i32
    return %c0_i32, %c0_i32_0 : i32, i32
  }
  func.func @transform_4(%arg0: i32) -> (i32, i32) {
    %c0_i32 = arith.constant 0 : i32
    %c0_i32_0 = arith.constant 0 : i32
    %c0_i32_1 = arith.constant 0 : i32
    return %c0_i32, %c0_i32_0 : i32, i32
  }
  func.func @transform_5(%arg0: i32) -> (i32, i32) {
    %c0_i32 = arith.constant 0 : i32
    %c0_i32_0 = arith.constant 0 : i32
    return %c0_i32, %arg0 : i32, i32
  }
}

</mosaic_0001>

<bundles_post_ra>
// kernel: tpu_custom_call.1
= control target key start
LH: loop header
LB: loop body
LE: loop exit
PB: predicated region body
PF: predicated region fallthrough
CT: control target
= control target key end

     0   :  { %10 = vsyncpa [#allocation3], 0  ;;  %s6153_s0 = inlined_call_operand.vmem [shape: f32[3,2048], index: 0, kind: input, shape index: {}]   ;;  %s6154_s1 = inlined_call_operand.vmem [shape: f32[32,3], index: 1, kind: input, shape index: {}]   ;;  %s6155_s2 = inlined_call_operand.vmem [shape: f32[96,32], index: 2, kind: input, shape index: {}]   ;;  %s6156_s3 = inlined_call_operand.vmem [shape: f32[2,32], index: 3, kind: input, shape index: {}]   ;;  %s6157_s4 = inlined_call_operand.vmem [shape: f32[32,5], index: 4, kind: input, shape index: {}]   ;;  %s6158_s5 = inlined_call_operand.hbm [shape: f32[2,2048], index: 5, kind: output, shape index: {}]  }
   0x1   :  { %12 = vsyncpa [#allocation3 + $0x1], 0  ;;  %s4411_s18 = smov 0   ;;  %s4413_s19 = smov 0  }
   0x2   :  { %s4415_s20 = smov 0   ;;  %s4417_s21 = smov 0  }
   0x3 LB: > { %s4432_s22 = sadd.s32 4294967295, %s4365_s21   ;;  %s3636_s23 = sadd.s32 4294967294, %s4365_s21   ;;  %s4365_s21 = sphi %s4417_s21, %s6195_s21   ;;  %s4361_s20 = sphi %s4415_s20, %s6194_s20   ;;  %s4357_s19 = sphi %s4413_s19, %s6193_s19   ;;  %s4353_s18 = sphi %s4411_s18, %s6192_s18  }
   0x4   : > { %s4436_s24 = sadd.s32 1, %s4365_s21   ;;  %s135_s25 = sadd.s32 1, %s4361_s20 }
   0x5   : > { %s132_s26 = ssub.s32 %s4365_s21, %s4436_s24  ;;  %p145_p0 = scmp.ne.s32.totalorder %s4361_s20, %s4357_s19 }
   0x6   : > { %p133_p1 = scmp.eq.s32.totalorder %s132_s26, 0  ;;  %p146_p2 = scmp.eq.s32.totalorder %s4432_s22, 1 }
   0x7   : > { %p151_p3 = scmp.ne.s32.totalorder %s4357_s19, %s4353_s18  ;;  %p152_p4 = scmp.eq.s32.totalorder %s3636_s23, 1 }
   0x8   : > { %s4447_s27 = scalar_select %p133_p1, %s4361_s20, %s135_s25  }
   0x9   : > { %p4449_p5 = por %p146_p2, %p145_p0  ;;  %p4453_p6 = por %p152_p4, %p151_p3 }
   0xa   : > { %p3639_p7 = scmp.ge.s32.totalorder %s4365_s21, 1  ;;  %p191_p8 = scmp.lt.s32.totalorder %s4365_s21, 3 }
   0xc   : > { %p192_p9 = pnand %p3639_p7, %p191_p8 }
   0xd   : > { %s3641_s30 = sshll.u32 (!%p192_p9), %s4432_s22, 3  ;;  %v4367_v0 = vmov (!%p192_p9), 0.0   ;;  %v4465_v1 = vld [vmem:[%s6157_s4] sm:$0xff] (!%p192_p9)  ;;  %v4368_v2 = vmov (!%p192_p9), 0   ;;  %v4470_v3 = vld [vmem:[%s6157_s4 + $0x10] sm:$0xff] (!%p192_p9)  ;;  %v4477_v4 = vld [vmem:[%s6157_s4 + $0x8] sm:$0xff] (!%p192_p9) }
   0xe   : > { %195 = sbr.rel (%p192_p9) target bundleno = 1327 (0x52f), region = 40  ;;  %p220_p10 = scmp.lt.s32.totalorder (!%p192_p9), %s3641_s30, 15  ;;  %374 = vmatprep.mubr.f32.mxu0 (!%p192_p9), %v4367_v0  ;;  %463 = vmatprep.mubr.f32.mxu1 (!%p192_p9), %v4367_v0  ;;  %v4482_v5 = vld [vmem:[%s6157_s4 + $0x18] sm:$0xff] (!%p192_p9)  ;;  %vm293_vm0 = vcmask (!%p192_p9), 1042432   ;;  %v230_v12 = vld [vmem:[%s6154_s1] sm:$0xff] (!%p192_p9)  ;;  %vm280_vm1 = vcmask (!%p192_p9), 23552  }
   0xf   : > { %3985 = vset.pattern.permute.xlu0 (!%p192_p9), %v4368_v2  ;;  %3986 = vset.pattern.permute.xlu1 (!%p192_p9), %v4368_v2  ;;  %v231_v15 = vld [vmem:[%s6154_s1 + $0x8] sm:$0xff] (!%p192_p9)  ;;  %v232_v16 = vld [vmem:[%s6154_s1 + $0x10] sm:$0xff] (!%p192_p9)  ;;  %v233_v17 = vld [vmem:[%s6154_s1 + $0x18] sm:$0xff] (!%p192_p9)  ;;  %v4369_v18 = vmov (!%p192_p9), 1   ;;  %vm714_vm2 = vcmask (!%p192_p9), 261120  }
  0x10   : > { %254 = vperm.xlu0 (!%p192_p9), %3985, %v4465_v1   ;;  %264 = vperm.xlu1 (!%p192_p9), %3986, %v4470_v3  }
  0x14   : > { %259 = vperm.xlu0 (!%p192_p9), %3985, %v4477_v4   ;;  %269 = vperm.xlu1 (!%p192_p9), %3986, %v4482_v5  }
  0x15   : > { %s6197_s30 = smov (!%p220_p10, %s3641_s30), 15 }
  0x16   : > { %s3642_s14 = sshll.u32 %s6197_s30, 2 }
  0x17   : > { %s4487_s17 = scalar_lea.vmem %s6153_s0, %s3642_s14  ;;  %s216_s14 = sand.u32 1, %s4357_s19  }
  0x18   : > { %v226_v6 = vld [vmem:[%s4487_s17] sm:$0x77]  ;;  %v227_v7 = vld [vmem:[%s4487_s17 + $0x8] sm:$0x77]  ;;  %v228_v8 = vld [vmem:[%s4487_s17 + $0x10] sm:$0x77]  ;;  %3987 = vset.pattern.permute.xlu0 %v4369_v18  ;;  %3988 = vset.pattern.permute.xlu1 %v4369_v18 }
  0x19   : > { %v276_v9 = vcombine.high %v226_v6, %v226_v6  ;;  %v277_v10 = vcombine.high %v227_v7, %v227_v7  ;;  %v229_v11 = vld [vmem:[%s4487_s17 + $0x18] sm:$0x77]  ;;  %v278_v13 = vcombine.high %v228_v8, %v228_v8  ;;  %699 = vperm.xlu0 %3987, %v4465_v1   ;;  %703 = vperm.xlu1 %3988, %v4477_v4   ;;  %s3640_s15 = sshll.u32 %s216_s14, 4  ;;  %s3563_s6 = scalar_lea.sflag [#allocation3], %s216_s14 }
  0x1a   : > { %v279_v14 = vcombine.high %v229_v11, %v229_v11  ;;  %s6034_s16 = scalar_lea.vmem [#allocation2], %s3640_s15 }
  0x1b   : > { %3643 = vmatprep.subr.msk.mxu0 %vm293_vm0, %v276_v9  ;;  %3649 = vmatprep.subr.msk.mxu1 %vm293_vm0, %v277_v10  ;;  %s3577_s23 = sshll.u32 %s6034_s16, 4  ;;  %s6110_s23 = int_to_ptr.vmem [resolvable:$true] %s3577_s23 }
  0x1c   : > { %3644 = vmatpush1.msk.msra.mxu0 %vm293_vm0, %v226_v6  ;;  %3650 = vmatpush1.msk.msra.mxu1 %vm293_vm0, %v227_v7  ;;  %s4303_s7 = scalar_lea.vmem %s6110_s23, 256 }
  0x1d   : > { %3645 = vmatmul.mubr.msk.f32.vlgmr.msra.gmra.mrb[0].mxu0 %vm280_vm1, %v230_v12  ;;  %3651 = vmatmul.mubr.msk.f32.vlgmr.msra.gmra.mrb[0].mxu1 %vm280_vm1, %v230_v12  ;;  %p4304_p11 = scmp.ne.s32.totalorder %s6110_s23, %s4303_s7 }
  0x1e   : > { %380 = vmatprep.mubr.f32.mxu0 %v4367_v0  ;;  %469 = vmatprep.mubr.f32.mxu1 %v4367_v0 }
  0x1f   : > { %3655 = vmatprep.subr.msk.mxu0 %vm293_vm0, %v278_v13  ;;  %3661 = vmatprep.subr.msk.mxu1 %vm293_vm0, %v279_v14  ;;  %p4305_p12 = pnand %p4304_p11, %p4449_p5 }
  0x20   : > { %3656 = vmatpush1.msk.msra.mxu0 %vm293_vm0, %v228_v8  ;;  %3662 = vmatpush1.msk.msra.mxu1 %vm293_vm0, %v229_v11 }
  0x21   : > { %3646 = vmatmul.mubr.msk.f32.gmra.mrb[2].mxu0 %vm280_vm1, %v231_v15  ;;  %3652 = vmatmul.mubr.msk.f32.gmra.mrb[2].mxu1 %vm280_vm1, %v231_v15  ;;  %p4306_p13 = pneg %p4305_p12 }
  0x22   : > { %386 = vmatprep.mubr.f32.mxu0 %v4367_v0  ;;  %475 = vmatprep.mubr.f32.mxu1 %v4367_v0 }
  0x23   : > { %707 = vperm.xlu1 %3988, %v4470_v3   ;;  %711 = vperm.xlu0 %3987, %v4482_v5  }
  0x25   : > { %3647 = vmatmul.mubr.msk.f32.gmra.mrb[4].mxu0 %vm280_vm1, %v232_v16  ;;  %3653 = vmatmul.mubr.msk.f32.gmra.mrb[4].mxu1 %vm280_vm1, %v232_v16 }
  0x26   : > { %392 = vmatprep.mubr.f32.mxu0 %v4367_v0  ;;  %481 = vmatprep.mubr.f32.mxu1 %v4367_v0 }
  0x29   : > { %3648 = vmatmul.mubr.msk.f32.gmra.mrb[6].mxu0 %vm280_vm1, %v233_v17  ;;  %3654 = vmatmul.mubr.msk.f32.gmra.mrb[6].mxu1 %vm280_vm1, %v233_v17 }
  0x2a   : > { %552 = vmatprep.mubr.f32.mxu0 %v4367_v0  ;;  %641 = vmatprep.mubr.f32.mxu1 %v4367_v0 }
  0x2d   : > { %3657 = vmatmul.mubr.msk.f32.vlgmr.msra.gmra.mrb[8].mxu0 %vm280_vm1, %v230_v12  ;;  %3663 = vmatmul.mubr.msk.f32.vlgmr.msra.gmra.mrb[8].mxu1 %vm280_vm1, %v230_v12 }
  0x2e   : > { %558 = vmatprep.mubr.f32.mxu0 %v4367_v0  ;;  %647 = vmatprep.mubr.f32.mxu1 %v4367_v0 }
  0x31   : > { %3658 = vmatmul.mubr.msk.f32.gmra.mrb[10].mxu0 %vm280_vm1, %v231_v15  ;;  %3664 = vmatmul.mubr.msk.f32.gmra.mrb[10].mxu1 %vm280_vm1, %v231_v15 }
  0x32   : > { %564 = vmatprep.mubr.f32.mxu0 %v4367_v0  ;;  %653 = vmatprep.mubr.f32.mxu1 %v4367_v0 }
  0x35   : > { %3659 = vmatmul.mubr.msk.f32.gmra.mrb[12].mxu0 %vm280_vm1, %v232_v16  ;;  %3665 = vmatmul.mubr.msk.f32.gmra.mrb[12].mxu1 %vm280_vm1, %v232_v16 }
  0x36   : > { %570 = vmatprep.mubr.f32.mxu0 %v4367_v0  ;;  %659 = vmatprep.mubr.f32.mxu1 %v4367_v0 }
  0x39   : > { %3660 = vmatmul.mubr.msk.f32.gmra.mrb[14].mxu0 %vm280_vm1, %v233_v17  ;;  %3666 = vmatmul.mubr.msk.f32.gmra.mrb[14].mxu1 %vm280_vm1, %v233_v17 }
  0x3a   : > { %791 = vmatprep.mubr.f32.mxu0 %v4367_v0  ;;  %880 = vmatprep.mubr.f32.mxu1 %v4367_v0 }
  0x8f   : > { %v4551_v19 = vpop.permute.xlu0 %254  ;;  %v4564_v28 = vpop.permute.xlu1 %264 }
  0x93   : > { %v4556_v25 = vpop.permute.xlu0 %259  ;;  %v4598_v45 = vpop.permute.xlu1 %269 }
  0xf0   : > { %v376_v20 = vpop.f32.mrb[0].mxu0  ;;  %v465_v21 = vpop.f32.mrb[0].mxu1 }
  0xf1   : > { %v4554_v22 = vadd.f32 %v376_v20, %v4551_v19  ;;  %v378_v23 = vpop.f32.mrb[1].mxu0  ;;  %v467_v24 = vpop.f32.mrb[1].mxu1  ;;  %v4582_v37 = vadd.f32 %v465_v21, %v4551_v19 }
  0xf2   : > { %v4559_v26 = vadd.f32 %v378_v23, %v4551_v19  ;;  %v4562_v27 = vadd.f32 %v467_v24, %v4551_v19 }
  0xf3   : > { %3999 = vtanh.f32 %v4554_v22 }
  0xf4   : > { %v382_v29 = vpop.f32.mrb[2].mxu0  ;;  %v471_v30 = vpop.f32.mrb[2].mxu1  ;;  %4001 = vtanh.f32 %v4559_v26 }
  0xf5   : > { %v4569_v31 = vadd.f32 %v382_v29, %v4556_v25  ;;  %v4572_v32 = vadd.f32 %v471_v30, %v4556_v25  ;;  %v384_v33 = vpop.f32.mrb[3].mxu0  ;;  %v473_v34 = vpop.f32.mrb[3].mxu1  ;;  %4003 = vtanh.f32 %v4562_v27 }
  0xf6   : > { %v4576_v35 = vadd.f32 %v384_v33, %v4556_v25  ;;  %v4579_v36 = vadd.f32 %v473_v34, %v4556_v25 }
  0xf7   : > { %4005 = vtanh.f32 %v4569_v31 }
  0xf8   : > { %4007 = vtanh.f32 %v4572_v32  ;;  %v388_v38 = vpop.f32.mrb[4].mxu0  ;;  %v477_v39 = vpop.f32.mrb[4].mxu1 }
  0xf9   : > { %4009 = vtanh.f32 %v4576_v35  ;;  %v4588_v40 = vadd.f32 %v388_v38, %v4564_v28  ;;  %v390_v41 = vpop.f32.mrb[5].mxu0  ;;  %v479_v42 = vpop.f32.mrb[5].mxu1  ;;  %v4616_v56 = vadd.f32 %v477_v39, %v4564_v28 }
  0xfa   : > { %4011 = vtanh.f32 %v4579_v36  ;;  %v4592_v43 = vadd.f32 %v390_v41, %v4564_v28  ;;  %v4595_v44 = vadd.f32 %v479_v42, %v4564_v28 }
  0xfb   : > { %4013 = vtanh.f32 %v4582_v37 }
  0xfc   : > { %4015 = vtanh.f32 %v4588_v40  ;;  %v394_v46 = vpop.f32.mrb[6].mxu0  ;;  %v483_v47 = vpop.f32.mrb[6].mxu1 }
  0xfd   : > { %4017 = vtanh.f32 %v4592_v43  ;;  %v4603_v48 = vadd.f32 %v394_v46, %v4598_v45  ;;  %v4606_v49 = vadd.f32 %v483_v47, %v4598_v45  ;;  %v396_v50 = vpop.f32.mrb[7].mxu0  ;;  %v485_v51 = vpop.f32.mrb[7].mxu1 }
  0xfe   : > { %v4000_v52 = vpop.eup %3999  ;;  %4019 = vtanh.f32 %v4595_v44  ;;  %v4610_v53 = vadd.f32 %v396_v50, %v4598_v45  ;;  %v4613_v54 = vadd.f32 %v485_v51, %v4598_v45 }
  0xff   : > { %v4002_v55 = vpop.eup %4001  ;;  %4021 = vtanh.f32 %v4603_v48 }
 0x100   : > { %v4004_v57 = vpop.eup %4003  ;;  %4023 = vtanh.f32 %v4606_v49  ;;  %v554_v58 = vpop.f32.mrb[8].mxu0 }
 0x101   : > { %v643_v59 = vpop.f32.mrb[8].mxu1  ;;  %v4006_v60 = vpop.eup %4005  ;;  %4025 = vtanh.f32 %v4610_v53  ;;  %v4622_v61 = vadd.f32 %v554_v58, %v4551_v19 }
 0x102   : > { %v556_v62 = vpop.f32.mrb[9].mxu0  ;;  %v645_v63 = vpop.f32.mrb[9].mxu1  ;;  %4027 = vtanh.f32 %v4613_v54  ;;  %v3775_v13 = vpack.c.bf16 %v4006_v60, %v4000_v52  ;;  %v4648_v33 = vadd.f32 %v643_v59, %v4551_v19 }
 0x103   : > { %v4008_v2 = vpop.eup %4007  ;;  %v4626_v6 = vadd.f32 %v556_v62, %v4551_v19  ;;  %v4629_v7 = vadd.f32 %v645_v63, %v4551_v19  ;;  %4029 = vtanh.f32 %v4616_v56 }
 0x104   : > { %v4010_v8 = vpop.eup %4009  ;;  %4031 = vtanh.f32 %v4622_v61  ;;  %v560_v10 = vpop.f32.mrb[10].mxu0 }
 0x105   : > { %v4012_v9 = vpop.eup %4011  ;;  %v649_v11 = vpop.f32.mrb[10].mxu1  ;;  %v3773_v12 = vpack.c.bf16 %v4010_v8, %v4002_v55  ;;  %4033 = vtanh.f32 %v4626_v6  ;;  %v4635_v15 = vadd.f32 %v560_v10, %v4556_v25 }
 0x106   : > { %v4014_v14 = vpop.eup %4013  ;;  %v4638_v16 = vadd.f32 %v649_v11, %v4556_v25  ;;  %v562_v17 = vpop.f32.mrb[11].mxu0  ;;  %v3781_v20 = vpack.c.bf16 %v4012_v9, %v4004_v57  ;;  %4035 = vtanh.f32 %v4629_v7 }
 0x107   : > { %v651_v18 = vpop.f32.mrb[11].mxu1  ;;  %v4016_v21 = vpop.eup %4015  ;;  %v4642_v23 = vadd.f32 %v562_v17, %v4556_v25  ;;  %3774 = vmatprep.subr.bf16.mxu0 %v3773_v12  ;;  %v3783_v29 = vpack.c.bf16 %v4008_v2, %v4014_v14  ;;  %4037 = vtanh.f32 %v4635_v15 }
 0x108   : > { %v4645_v24 = vadd.f32 %v651_v18, %v4556_v25  ;;  %v4018_v30 = vpop.eup %4017  ;;  %3782 = vmatprep.subr.bf16.mxu1 %v3781_v20  ;;  %3776 = vmatpush1.bf16.msra.mxu0 %v3775_v13  ;;  %4039 = vtanh.f32 %v4638_v16  ;;  %v566_v38 = vpop.f32.mrb[12].mxu0  ;;  %v234_v18 = vld [vmem:[%s6155_s2] sm:$0xff] }
 0x109   : > { %v4020_v34 = vpop.eup %4019  ;;  %3784 = vmatpush1.bf16.msra.mxu1 %v3783_v29  ;;  %v655_v39 = vpop.f32.mrb[12].mxu1  ;;  %4041 = vtanh.f32 %v4642_v23  ;;  %v4654_v25 = vadd.f32 %v566_v38, %v4564_v28  ;;  %v235_v29 = vld [vmem:[%s6155_s2 + $0x8] sm:$0xff] }
 0x10a   : > { %v4022_v41 = vpop.eup %4021  ;;  %v568_v42 = vpop.f32.mrb[13].mxu0  ;;  %4043 = vtanh.f32 %v4645_v24  ;;  %v4680_v17 = vadd.f32 %v655_v39, %v4564_v28 }
 0x10b   : > { %v657_v46 = vpop.f32.mrb[13].mxu1  ;;  %v4024_v19 = vpop.eup %4023  ;;  %v4658_v47 = vadd.f32 %v568_v42, %v4564_v28  ;;  %4045 = vtanh.f32 %v4648_v33  ;;  %v3779_v59 = vpack.c.bf16 %v4022_v41, %v4016_v21 }
 0x10c   : > { %v4661_v50 = vadd.f32 %v657_v46, %v4564_v28  ;;  %v4026_v51 = vpop.eup %4025  ;;  %4047 = vtanh.f32 %v4654_v25  ;;  %v572_v55 = vpop.f32.mrb[14].mxu0 }
 0x10d   : > { %v4028_v52 = vpop.eup %4027  ;;  %v661_v57 = vpop.f32.mrb[14].mxu1  ;;  %v3777_v58 = vpack.c.bf16 %v4026_v51, %v4018_v30  ;;  %4049 = vtanh.f32 %v4658_v47  ;;  %v4667_v62 = vadd.f32 %v572_v55, %v4598_v45  ;;  %v236_v51 = vld [vmem:[%s6155_s2 + $0x10] sm:$0xff] }
 0x10e   : > { %v4030_v60 = vpop.eup %4029  ;;  %v4670_v63 = vadd.f32 %v661_v57, %v4598_v45  ;;  %v574_v2 = vpop.f32.mrb[15].mxu0  ;;  %v3785_v9 = vpack.c.bf16 %v4028_v52, %v4020_v34  ;;  %4051 = vtanh.f32 %v4661_v50 }
 0x10f   : > { %v663_v8 = vpop.f32.mrb[15].mxu1  ;;  %v4032_v10 = vpop.eup %4031  ;;  %v4674_v11 = vadd.f32 %v574_v2, %v4598_v45  ;;  %3778 = vmatprep.subr.bf16.mxu0 %v3777_v58  ;;  %v3787_v13 = vpack.c.bf16 %v4024_v19, %v4030_v60  ;;  %4053 = vtanh.f32 %v4667_v62 }
 0x110   : > { %v4677_v12 = vadd.f32 %v663_v8, %v4598_v45  ;;  %v4034_v14 = vpop.eup %4033  ;;  %3786 = vmatprep.subr.bf16.mxu1 %v3785_v9  ;;  %3780 = vmatpush1.bf16.msra.mxu0 %v3779_v59  ;;  %4055 = vtanh.f32 %v4670_v63  ;;  %v237_v59 = vld [vmem:[%s6155_s2 + $0x18] sm:$0xff] }
 0x111   : > { %v4036_v20 = vpop.eup %4035  ;;  %3788 = vmatpush1.bf16.msra.mxu1 %v3787_v13  ;;  %4057 = vtanh.f32 %v4674_v11 }
 0x112   : > { %v4038_v45 = vpop.eup %4037  ;;  %4059 = vtanh.f32 %v4677_v12 }
 0x113   : > { %v4040_v21 = vpop.eup %4039  ;;  %3667 = vmatmul.mubr.msk.f32.vlgmr.msra.gmra.mrb[16].mxu0 %vm714_vm2, %v234_v18  ;;  %4061 = vtanh.f32 %v4680_v17  ;;  %v3791_v42 = vpack.c.bf16 %v4038_v45, %v4032_v10  ;;  %v4737_v45 = vpop.permute.xlu1 %703 }
 0x114   : > { %v4042_v28 = vpop.eup %4041  ;;  %3671 = vmatmul.mubr.msk.f32.vlgmr.msra.gmra.mrb[16].mxu1 %vm714_vm2, %v234_v18  ;;  %797 = vmatprep.mubr.f32.mxu0 %v4367_v0 }
 0x115   : > { %v4044_v30 = vpop.eup %4043  ;;  %886 = vmatprep.mubr.f32.mxu1 %v4367_v0  ;;  %v3789_v34 = vpack.c.bf16 %v4042_v28, %v4034_v14  ;;  %v4370_v14 = vmov 2  }
 0x116   : > { %v4046_v38 = vpop.eup %4045  ;;  %v3797_v39 = vpack.c.bf16 %v4044_v30, %v4036_v20  ;;  %3989 = vset.pattern.permute.xlu1 %v4370_v14  ;;  %3990 = vset.pattern.permute.xlu0 %v4370_v14 }
 0x117   : > { %v4048_v41 = vpop.eup %4047  ;;  %3668 = vmatmul.mubr.msk.f32.gmra.mrb[18].mxu0 %vm714_vm2, %v235_v29  ;;  %3790 = vmatprep.subr.bf16.mxu0 %v3789_v34  ;;  %v3799_v46 = vpack.c.bf16 %v4040_v21, %v4046_v38 }
 0x118   : > { %v4050_v19 = vpop.eup %4049  ;;  %3672 = vmatmul.mubr.msk.f32.gmra.mrb[18].mxu1 %vm714_vm2, %v235_v29  ;;  %3798 = vmatprep.subr.bf16.mxu1 %v3797_v39 }
 0x119   : > { %v4052_v52 = vpop.eup %4051  ;;  %3792 = vmatpush1.bf16.msra.mxu0 %v3791_v42  ;;  %3800 = vmatpush1.bf16.msra.mxu1 %v3799_v46  ;;  %v4745_v46 = vpop.permute.xlu1 %707 }
 0x11a   : > { %v4054_v55 = vpop.eup %4053  ;;  %803 = vmatprep.mubr.f32.mxu0 %v4367_v0  ;;  %892 = vmatprep.mubr.f32.mxu1 %v4367_v0 }
 0x11b   : > { %v4056_v57 = vpop.eup %4055  ;;  %3669 = vmatmul.mubr.msk.f32.gmra.mrb[20].mxu0 %vm714_vm2, %v236_v51  ;;  %v3795_v10 = vpack.c.bf16 %v4054_v55, %v4048_v41  ;;  %1148 = vperm.xlu1 %3989, %v4465_v1  }
 0x11c   : > { %v4058_v58 = vpop.eup %4057  ;;  %3673 = vmatmul.mubr.msk.f32.gmra.mrb[20].mxu1 %vm714_vm2, %v236_v51  ;;  %809 = vmatprep.mubr.f32.mxu0 %v4367_v0 }
 0x11d   : > { %v4060_v60 = vpop.eup %4059  ;;  %898 = vmatprep.mubr.f32.mxu1 %v4367_v0  ;;  %v3793_v2 = vpack.c.bf16 %v4058_v58, %v4050_v19  ;;  %1152 = vperm.xlu0 %3990, %v4477_v4  }
 0x11e   : > { %v4062_v8 = vpop.eup %4061  ;;  %v3801_v9 = vpack.c.bf16 %v4060_v60, %v4052_v52 }
 0x11f   : > { %3670 = vmatmul.mubr.msk.f32.gmra.mrb[22].mxu0 %vm714_vm2, %v237_v59  ;;  %3794 = vmatprep.subr.bf16.mxu0 %v3793_v2  ;;  %v3803_v13 = vpack.c.bf16 %v4056_v57, %v4062_v8 }
 0x120   : > { %3674 = vmatmul.mubr.msk.f32.gmra.mrb[22].mxu1 %vm714_vm2, %v237_v59  ;;  %3802 = vmatprep.subr.bf16.mxu1 %v3801_v9 }
 0x121   : > { %3796 = vmatpush1.bf16.msra.mxu0 %v3795_v10  ;;  %3804 = vmatpush1.bf16.msra.mxu1 %v3803_v13 }
 0x122   : > { %969 = vmatprep.mubr.f32.mxu0 %v4367_v0  ;;  %1058 = vmatprep.mubr.f32.mxu1 %v4367_v0 }
 0x123   : > { %1156 = vperm.xlu1 %3989, %v4470_v3  }
 0x124   : > { %3675 = vmatmul.mubr.msk.f32.vlgmr.msra.gmra.mrb[24].mxu0 %vm714_vm2, %v234_v18  ;;  %3679 = vmatmul.mubr.msk.f32.vlgmr.msra.gmra.mrb[24].mxu1 %vm714_vm2, %v234_v18  ;;  %v4735_v18 = vpop.permute.xlu0 %699 }
 0x125   : > { %975 = vmatprep.mubr.f32.mxu0 %v4367_v0  ;;  %1064 = vmatprep.mubr.f32.mxu1 %v4367_v0 }
 0x127   : > { %1160 = vperm.xlu1 %3989, %v4482_v5  }
 0x128   : > { %3676 = vmatmul.mubr.msk.f32.gmra.mrb[26].mxu0 %vm714_vm2, %v235_v29  ;;  %3680 = vmatmul.mubr.msk.f32.gmra.mrb[26].mxu1 %vm714_vm2, %v235_v29  ;;  %v4753_v10 = vpop.permute.xlu0 %711 }
 0x129   : > { %981 = vmatprep.mubr.f32.mxu0 %v4367_v0  ;;  %1070 = vmatprep.mubr.f32.mxu1 %v4367_v0 }
 0x12c   : > { %3677 = vmatmul.mubr.msk.f32.gmra.mrb[28].mxu0 %vm714_vm2, %v236_v51  ;;  %3681 = vmatmul.mubr.msk.f32.gmra.mrb[28].mxu1 %vm714_vm2, %v236_v51 }
 0x12d   : > { %987 = vmatprep.mubr.f32.mxu0 %v4367_v0  ;;  %1076 = vmatprep.mubr.f32.mxu1 %v4367_v0 }
 0x130   : > { %3678 = vmatmul.mubr.msk.f32.gmra.mrb[30].mxu0 %vm714_vm2, %v237_v59  ;;  %3682 = vmatmul.mubr.msk.f32.gmra.mrb[30].mxu1 %vm714_vm2, %v237_v59 }
 0x131   : > { %1239 = vmatprep.mubr.f32.mxu0 %v4367_v0  ;;  %1328 = vmatprep.mubr.f32.mxu1 %v4367_v0 }
 0x1e6   : > { %v793_v20 = vpop.f32.mrb[16].mxu0 }
 0x1e7   : > { %v794_v21 = vadd.f32 %v793_v20, %v4735_v18  ;;  %v882_v28 = vpop.f32.mrb[16].mxu1  ;;  %v795_v29 = vpop.f32.mrb[17].mxu0 }
 0x1e8   : > { %v883_v30 = vadd.f32 %v882_v28, %v4735_v18  ;;  %v796_v34 = vadd.f32 %v795_v29, %v4735_v18  ;;  %v884_v1 = vpop.f32.mrb[17].mxu1 }
 0x1e9   : > { %4063 = vtanh.f32 %v794_v21  ;;  %v885_v38 = vadd.f32 %v884_v1, %v4735_v18 }
 0x1ea   : > { %4065 = vtanh.f32 %v883_v30  ;;  %v799_v3 = vpop.f32.mrb[18].mxu0 }
 0x1eb   : > { %4067 = vtanh.f32 %v796_v34  ;;  %v800_v5 = vadd.f32 %v799_v3, %v4737_v45  ;;  %v888_v39 = vpop.f32.mrb[18].mxu1  ;;  %v801_v41 = vpop.f32.mrb[19].mxu0 }
 0x1ec   : > { %4069 = vtanh.f32 %v885_v38  ;;  %v889_v42 = vadd.f32 %v888_v39, %v4737_v45  ;;  %v802_v19 = vadd.f32 %v801_v41, %v4737_v45  ;;  %v890_v51 = vpop.f32.mrb[19].mxu1 }
 0x1ed   : > { %4071 = vtanh.f32 %v800_v5  ;;  %v891_v52 = vadd.f32 %v890_v51, %v4737_v45 }
 0x1ee   : > { %4073 = vtanh.f32 %v889_v42  ;;  %v805_v55 = vpop.f32.mrb[20].mxu0 }
 0x1ef   : > { %4075 = vtanh.f32 %v802_v19  ;;  %v806_v57 = vadd.f32 %v805_v55, %v4745_v46  ;;  %v894_v58 = vpop.f32.mrb[20].mxu1  ;;  %v807_v59 = vpop.f32.mrb[21].mxu0 }
 0x1f0   : > { %4077 = vtanh.f32 %v891_v52  ;;  %v895_v60 = vadd.f32 %v894_v58, %v4745_v46  ;;  %v808_v2 = vadd.f32 %v807_v59, %v4745_v46  ;;  %v896_v8 = vpop.f32.mrb[21].mxu1 }
 0x1f1   : > { %4079 = vtanh.f32 %v806_v57  ;;  %v897_v9 = vadd.f32 %v896_v8, %v4745_v46 }
 0x1f2   : > { %4081 = vtanh.f32 %v895_v60  ;;  %v811_v13 = vpop.f32.mrb[22].mxu0 }
 0x1f3   : > { %v4064_v14 = vpop.eup %4063  ;;  %4083 = vtanh.f32 %v808_v2  ;;  %v812_v20 = vadd.f32 %v811_v13, %v4753_v10  ;;  %v900_v21 = vpop.f32.mrb[22].mxu1 }
 0x1f4   : > { %v813_v28 = vpop.f32.mrb[23].mxu0  ;;  %v4066_v29 = vpop.eup %4065  ;;  %4085 = vtanh.f32 %v897_v9  ;;  %v901_v30 = vadd.f32 %v900_v21, %v4753_v10  ;;  %v1115_v19 = vadd.f32 %v4064_v14, %v4554_v22 }
 0x1f5   : > { %v814_v34 = vadd.f32 %v813_v28, %v4753_v10  ;;  %v902_v1 = vpop.f32.mrb[23].mxu1  ;;  %v4068_v38 = vpop.eup %4067  ;;  %4087 = vtanh.f32 %v812_v20  ;;  %v1117_v9 = vadd.f32 %v4066_v29, %v4582_v37 }
 0x1f6   : > { %v903_v3 = vadd.f32 %v902_v1, %v4753_v10  ;;  %v4070_v5 = vpop.eup %4069  ;;  %4089 = vtanh.f32 %v901_v30  ;;  %v1116_v14 = vadd.f32 %v4068_v38, %v4559_v26 }
 0x1f7   : > { %v4072_v39 = vpop.eup %4071  ;;  %4091 = vtanh.f32 %v814_v34  ;;  %v971_v41 = vpop.f32.mrb[24].mxu0  ;;  %v1118_v34 = vadd.f32 %v4070_v5, %v4562_v27 }
 0x1f8   : > { %v1060_v42 = vpop.f32.mrb[24].mxu1  ;;  %v4074_v51 = vpop.eup %4073  ;;  %4093 = vtanh.f32 %v903_v3  ;;  %v972_v52 = vadd.f32 %v971_v41, %v4735_v18  ;;  %v1123_v59 = vadd.f32 %v4072_v39, %v4569_v31 }
 0x1f9   : > { %v1061_v55 = vadd.f32 %v1060_v42, %v4735_v18  ;;  %v973_v57 = vpop.f32.mrb[25].mxu0  ;;  %v1062_v58 = vpop.f32.mrb[25].mxu1  ;;  %v1125_v13 = vadd.f32 %v4074_v51, %v4572_v32 }
 0x1fa   : > { %v4076_v60 = vpop.eup %4075  ;;  %v974_v2 = vadd.f32 %v973_v57, %v4735_v18  ;;  %v1063_v8 = vadd.f32 %v1062_v58, %v4735_v18  ;;  %4095 = vtanh.f32 %v972_v52  ;;  %v3807_v21 = vpack.c.bf16 %v1123_v59, %v1115_v19 }
 0x1fb   : > { %v4078_v22 = vpop.eup %4077  ;;  %v1124_v20 = vadd.f32 %v4076_v60, %v4576_v35  ;;  %4097 = vtanh.f32 %v1061_v55  ;;  %v977_v30 = vpop.f32.mrb[26].mxu0  ;;  %v3815_v18 = vpack.c.bf16 %v1125_v13, %v1117_v9 }
 0x1fc   : > { %v4080_v28 = vpop.eup %4079  ;;  %v1066_v31 = vpop.f32.mrb[26].mxu1  ;;  %v1126_v1 = vadd.f32 %v4078_v22, %v4579_v36  ;;  %4099 = vtanh.f32 %v974_v2  ;;  %v978_v32 = vadd.f32 %v977_v30, %v4737_v45 }
 0x1fd   : > { %v4082_v3 = vpop.eup %4081  ;;  %v1067_v37 = vadd.f32 %v1066_v31, %v4737_v45  ;;  %v979_v29 = vpop.f32.mrb[27].mxu0  ;;  %v3805_v38 = vpack.c.bf16 %v1124_v20, %v1116_v14  ;;  %4101 = vtanh.f32 %v1063_v8  ;;  %v1131_v51 = vadd.f32 %v4080_v28, %v4588_v40 }
 0x1fe   : > { %v1068_v26 = vpop.f32.mrb[27].mxu1  ;;  %v4084_v35 = vpop.eup %4083  ;;  %v980_v39 = vadd.f32 %v979_v29, %v4737_v45  ;;  %v3813_v42 = vpack.c.bf16 %v1126_v1, %v1118_v34  ;;  %4103 = vtanh.f32 %v978_v32  ;;  %v1133_v52 = vadd.f32 %v4082_v3, %v4616_v56 }
 0x1ff   : > { %v1069_v41 = vadd.f32 %v1068_v26, %v4737_v45  ;;  %v4086_v27 = vpop.eup %4085  ;;  %3806 = vmatprep.subr.bf16.mxu0 %v3805_v38  ;;  %4105 = vtanh.f32 %v1067_v37  ;;  %v983_v5 = vpop.f32.mrb[28].mxu0  ;;  %v1132_v13 = vadd.f32 %v4084_v35, %v4592_v43  ;;  %v4794_v37 = vld [vmem:[%s6155_s2 + $0x20] sm:$0xff] }
 0x200   : > { %v4088_v36 = vpop.eup %4087  ;;  %3814 = vmatprep.subr.bf16.mxu1 %v3813_v42  ;;  %v1072_v19 = vpop.f32.mrb[28].mxu1  ;;  %3808 = vmatpush1.bf16.msra.mxu0 %v3807_v21  ;;  %4107 = vtanh.f32 %v980_v39  ;;  %v984_v57 = vadd.f32 %v983_v5, %v4745_v46 }
 0x201   : > { %v4090_v55 = vpop.eup %4089  ;;  %v1073_v45 = vadd.f32 %v1072_v19, %v4745_v46  ;;  %3816 = vmatpush1.bf16.msra.mxu1 %v3815_v18  ;;  %v985_v58 = vpop.f32.mrb[29].mxu0  ;;  %v1139_v60 = vadd.f32 %v4088_v36, %v4603_v48  ;;  %4109 = vtanh.f32 %v1069_v41  ;;  %v1134_v48 = vadd.f32 %v4086_v27, %v4595_v44 }
 0x202   : > { %v1074_v59 = vpop.f32.mrb[29].mxu1  ;;  %v4092_v2 = vpop.eup %4091  ;;  %v986_v8 = vadd.f32 %v985_v58, %v4745_v46  ;;  %v1141_v40 = vadd.f32 %v4090_v55, %v4606_v49  ;;  %4111 = vtanh.f32 %v984_v57 }
 0x203   : > { %v1075_v9 = vadd.f32 %v1074_v59, %v4745_v46  ;;  %v4094_v56 = vpop.eup %4093  ;;  %v1140_v22 = vadd.f32 %v4092_v2, %v4610_v53  ;;  %v3811_v14 = vpack.c.bf16 %v1139_v60, %v1131_v51  ;;  %4113 = vtanh.f32 %v1073_v45  ;;  %v989_v20 = vpop.f32.mrb[30].mxu0 }
 0x204   : > { %v1078_v21 = vpop.f32.mrb[30].mxu1  ;;  %v1142_v28 = vadd.f32 %v4094_v56, %v4613_v54  ;;  %v3819_v30 = vpack.c.bf16 %v1141_v40, %v1133_v52  ;;  %v4096_v31 = vpop.eup %4095  ;;  %4115 = vtanh.f32 %v986_v8  ;;  %v990_v46 = vadd.f32 %v989_v20, %v4753_v10 }
 0x205   : > { %v1079_v49 = vadd.f32 %v1078_v21, %v4753_v10  ;;  %v991_v34 = vpop.f32.mrb[31].mxu0  ;;  %v1080_v1 = vpop.f32.mrb[31].mxu1  ;;  %v3809_v43 = vpack.c.bf16 %v1140_v22, %v1132_v13  ;;  %4117 = vtanh.f32 %v1075_v9 }
 0x206   : > { %v4098_v18 = vpop.eup %4097  ;;  %v992_v53 = vadd.f32 %v991_v34, %v4753_v10  ;;  %v1081_v3 = vadd.f32 %v1080_v1, %v4753_v10  ;;  %v3817_v32 = vpack.c.bf16 %v1142_v28, %v1134_v48  ;;  %4119 = vtanh.f32 %v990_v46 }
 0x207   : > { %v4100_v44 = vpop.eup %4099  ;;  %3810 = vmatprep.subr.bf16.mxu0 %v3809_v43  ;;  %4121 = vtanh.f32 %v1079_v49  ;;  %v1119_v10 = vadd.f32 %v4096_v31, %v4622_v61  ;;  %v1121_v39 = vadd.f32 %v4098_v18, %v4648_v33  ;;  %v239_v61 = vld [vmem:[%s6155_s2 + $0x28] sm:$0xff]  ;;  %v4875_v31 = vpop.permute.xlu0 %1152 }
 0x208   : > { %v4102_v54 = vpop.eup %4101  ;;  %3818 = vmatprep.subr.bf16.mxu1 %v3817_v32  ;;  %3812 = vmatpush1.bf16.msra.mxu0 %v3811_v14  ;;  %4123 = vtanh.f32 %v992_v53  ;;  %v4867_v14 = vpop.permute.xlu1 %1148 }
 0x209   : > { %v4104_v29 = vpop.eup %4103  ;;  %3820 = vmatpush1.bf16.msra.mxu1 %v3819_v30  ;;  %4125 = vtanh.f32 %v1081_v3 }
 0x20a   : > { %v4106_v26 = vpop.eup %4105  ;;  %v1127_v38 = vadd.f32 %v4104_v29, %v4635_v15  ;;  %v1120_v15 = vadd.f32 %v4100_v44, %v4626_v6  ;;  %v240_v6 = vld [vmem:[%s6155_s2 + $0x30] sm:$0xff] }
 0x20b   : > { %v4108_v35 = vpop.eup %4107  ;;  %3683 = vmatmul.mubr.msk.f32.vlgmr.msra.gmra.mrb[32].mxu0 %vm714_vm2, %v4794_v37  ;;  %v1129_v41 = vadd.f32 %v4106_v26, %v4638_v16  ;;  %v1122_v16 = vadd.f32 %v4102_v54, %v4629_v7 }
 0x20c   : > { %v4110_v42 = vpop.eup %4109  ;;  %3687 = vmatmul.mubr.msk.f32.vlgmr.msra.gmra.mrb[32].mxu1 %vm714_vm2, %v4794_v37  ;;  %1245 = vmatprep.mubr.f32.mxu0 %v4367_v0  ;;  %v1128_v27 = vadd.f32 %v4108_v35, %v4642_v23  ;;  %v3823_v36 = vpack.c.bf16 %v1127_v38, %v1119_v10  ;;  %v4885_v18 = vpop.permute.xlu1 %1156 }
 0x20d   : > { %v4112_v5 = vpop.eup %4111  ;;  %1334 = vmatprep.mubr.f32.mxu1 %v4367_v0  ;;  %v1130_v33 = vadd.f32 %v4110_v42, %v4645_v24  ;;  %v3831_v19 = vpack.c.bf16 %v1129_v41, %v1121_v39 }
 0x20e   : > { %v4114_v51 = vpop.eup %4113  ;;  %v3821_v52 = vpack.c.bf16 %v1128_v27, %v1120_v15  ;;  %v1135_v24 = vadd.f32 %v4112_v5, %v4654_v25  ;;  %v241_v25 = vld [vmem:[%s6155_s2 + $0x38] sm:$0xff] }
 0x20f   : > { %v4116_v55 = vpop.eup %4115  ;;  %3684 = vmatmul.mubr.msk.f32.gmra.mrb[34].mxu0 %vm714_vm2, %v239_v61  ;;  %v3829_v57 = vpack.c.bf16 %v1130_v33, %v1122_v16  ;;  %v1137_v60 = vadd.f32 %v4114_v51, %v4680_v17 }
 0x210   : > { %v4118_v45 = vpop.eup %4117  ;;  %3688 = vmatmul.mubr.msk.f32.gmra.mrb[34].mxu1 %vm714_vm2, %v239_v61  ;;  %3822 = vmatprep.subr.bf16.mxu0 %v3821_v52  ;;  %v4914_v41 = vpop.permute.xlu1 %1160 }
 0x211   : > { %v4120_v23 = vpop.eup %4119  ;;  %3830 = vmatprep.subr.bf16.mxu1 %v3829_v57  ;;  %3824 = vmatpush1.bf16.msra.mxu0 %v3823_v36  ;;  %v1138_v17 = vadd.f32 %v4118_v45, %v4661_v50  ;;  %v4295_v50 = vld [vmem:[%s6157_s4] sm:$0xff] }
 0x212   : > { %v4122_v7 = vpop.eup %4121  ;;  %3832 = vmatpush1.bf16.msra.mxu1 %v3831_v19  ;;  %1251 = vmatprep.mubr.f32.mxu0 %v4367_v0  ;;  %v1143_v58 = vadd.f32 %v4120_v23, %v4667_v62  ;;  %v1136_v62 = vadd.f32 %v4116_v55, %v4658_v47  ;;  %v4371_v47 = vmov 3  }
 0x213   : > { %v4124_v59 = vpop.eup %4123  ;;  %1340 = vmatprep.mubr.f32.mxu1 %v4367_v0  ;;  %3685 = vmatmul.mubr.msk.f32.gmra.mrb[36].mxu0 %vm714_vm2, %v240_v6  ;;  %v1145_v2 = vadd.f32 %v4122_v7, %v4670_v63 }
 0x214   : > { %v4126_v8 = vpop.eup %4125  ;;  %3689 = vmatmul.mubr.msk.f32.gmra.mrb[36].mxu1 %vm714_vm2, %v240_v6  ;;  %1257 = vmatprep.mubr.f32.mxu0 %v4367_v0  ;;  %v1144_v9 = vadd.f32 %v4124_v59, %v4674_v11  ;;  %v3827_v40 = vpack.c.bf16 %v1143_v58, %v1135_v24  ;;  %v4296_v11 = vld [vmem:[%s6157_s4 + $0x10] sm:$0xff] }
 0x215   : > { %1346 = vmatprep.mubr.f32.mxu1 %v4367_v0  ;;  %v1146_v63 = vadd.f32 %v4126_v8, %v4677_v12  ;;  %v3835_v56 = vpack.c.bf16 %v1145_v2, %v1137_v60  ;;  %3991 = vset.pattern.permute.xlu0 %v4371_v47  ;;  %v4297_v12 = vld [vmem:[%s6157_s4 + $0x18] sm:$0xff] }
 0x216   : > { %v3825_v13 = vpack.c.bf16 %v1144_v9, %v1136_v62  ;;  %3992 = vset.pattern.permute.xlu1 %v4371_v47  ;;  %1564 = vperm.xlu0 %3991, %v4295_v50  }
 0x217   : > { %3686 = vmatmul.mubr.msk.f32.gmra.mrb[38].mxu0 %vm714_vm2, %v241_v25  ;;  %v3833_v22 = vpack.c.bf16 %v1146_v63, %v1138_v17  ;;  %1568 = vperm.xlu1 %3992, %v4477_v4  }
 0x218   : > { %3690 = vmatmul.mubr.msk.f32.gmra.mrb[38].mxu1 %vm714_vm2, %v241_v25  ;;  %3826 = vmatprep.subr.bf16.mxu0 %v3825_v13 }
 0x219   : > { %3834 = vmatprep.subr.bf16.mxu1 %v3833_v22  ;;  %3828 = vmatpush1.bf16.msra.mxu0 %v3827_v40 }
 0x21a   : > { %3836 = vmatpush1.bf16.msra.mxu1 %v3835_v56  ;;  %1417 = vmatprep.mubr.f32.mxu0 %v4367_v0 }
 0x21b   : > { %1506 = vmatprep.mubr.f32.mxu1 %v4367_v0  ;;  %1572 = vperm.xlu1 %3992, %v4296_v11  }
 0x21c   : > { %3691 = vmatmul.mubr.msk.f32.vlgmr.msra.gmra.mrb[40].mxu0 %vm714_vm2, %v4794_v37  ;;  %1576 = vperm.xlu0 %3991, %v4297_v12  }
 0x21d   : > { %3695 = vmatmul.mubr.msk.f32.vlgmr.msra.gmra.mrb[40].mxu1 %vm714_vm2, %v4794_v37  ;;  %1423 = vmatprep.mubr.f32.mxu0 %v4367_v0 }
 0x21e   : > { %1512 = vmatprep.mubr.f32.mxu1 %v4367_v0 }
 0x220   : > { %3692 = vmatmul.mubr.msk.f32.gmra.mrb[42].mxu0 %vm714_vm2, %v239_v61 }
 0x221   : > { %3696 = vmatmul.mubr.msk.f32.gmra.mrb[42].mxu1 %vm714_vm2, %v239_v61  ;;  %1429 = vmatprep.mubr.f32.mxu0 %v4367_v0 }
 0x222   : > { %1518 = vmatprep.mubr.f32.mxu1 %v4367_v0 }
 0x224   : > { %3693 = vmatmul.mubr.msk.f32.gmra.mrb[44].mxu0 %vm714_vm2, %v240_v6 }
 0x225   : > { %3697 = vmatmul.mubr.msk.f32.gmra.mrb[44].mxu1 %vm714_vm2, %v240_v6  ;;  %1435 = vmatprep.mubr.f32.mxu0 %v4367_v0 }
 0x226   : > { %1524 = vmatprep.mubr.f32.mxu1 %v4367_v0 }
 0x228   : > { %3694 = vmatmul.mubr.msk.f32.gmra.mrb[46].mxu0 %vm714_vm2, %v241_v25 }
 0x229   : > { %3698 = vmatmul.mubr.msk.f32.gmra.mrb[46].mxu1 %vm714_vm2, %v241_v25  ;;  %1655 = vmatprep.mubr.f32.mxu0 %v4367_v0 }
 0x22a   : > { %1744 = vmatprep.mubr.f32.mxu1 %v4367_v0 }
 0x2de   : > { %v1241_v20 = vpop.f32.mrb[32].mxu0 }
 0x2df   : > { %v4870_v21 = vadd.f32 %v1241_v20, %v4867_v14  ;;  %v1330_v48 = vpop.f32.mrb[32].mxu1  ;;  %v1243_v28 = vpop.f32.mrb[33].mxu0 }
 0x2e0   : > { %v4873_v4 = vadd.f32 %v1243_v28, %v4867_v14  ;;  %v1332_v30 = vpop.f32.mrb[33].mxu1  ;;  %v4895_v44 = vadd.f32 %v1330_v48, %v4867_v14 }
 0x2e1   : > { %v4878_v46 = vadd.f32 %v1332_v30, %v4867_v14  ;;  %4127 = vtanh.f32 %v4870_v21 }
 0x2e2   : > { %v1247_v49 = vpop.f32.mrb[34].mxu0  ;;  %4129 = vtanh.f32 %v4873_v4 }
 0x2e3   : > { %v4883_v34 = vadd.f32 %v1247_v49, %v4875_v31  ;;  %v1336_v1 = vpop.f32.mrb[34].mxu1  ;;  %v1249_v43 = vpop.f32.mrb[35].mxu0  ;;  %4131 = vtanh.f32 %v4878_v46 }
 0x2e4   : > { %v4889_v53 = vadd.f32 %v1336_v1, %v4875_v31  ;;  %v4892_v3 = vadd.f32 %v1249_v43, %v4875_v31  ;;  %v1338_v32 = vpop.f32.mrb[35].mxu1 }
 0x2e5   : > { %4133 = vtanh.f32 %v4883_v34  ;;  %v4899_v54 = vadd.f32 %v1338_v32, %v4875_v31 }
 0x2e6   : > { %4135 = vtanh.f32 %v4889_v53  ;;  %v1253_v37 = vpop.f32.mrb[36].mxu0 }
 0x2e7   : > { %4137 = vtanh.f32 %v4892_v3  ;;  %v4904_v29 = vadd.f32 %v1253_v37, %v4885_v18  ;;  %v1342_v26 = vpop.f32.mrb[36].mxu1  ;;  %v1255_v10 = vpop.f32.mrb[37].mxu0 }
 0x2e8   : > { %4139 = vtanh.f32 %v4899_v54  ;;  %v4908_v38 = vadd.f32 %v1255_v10, %v4885_v18  ;;  %v1344_v35 = vpop.f32.mrb[37].mxu1  ;;  %v4929_v51 = vadd.f32 %v1342_v26, %v4885_v18 }
 0x2e9   : > { %4141 = vtanh.f32 %v4895_v44  ;;  %v4912_v39 = vadd.f32 %v1344_v35, %v4885_v18 }
 0x2ea   : > { %4143 = vtanh.f32 %v4904_v29  ;;  %v1259_v42 = vpop.f32.mrb[38].mxu0 }
 0x2eb   : > { %4145 = vtanh.f32 %v4908_v38  ;;  %v4919_v61 = vadd.f32 %v1259_v42, %v4914_v41  ;;  %v1348_v15 = vpop.f32.mrb[38].mxu1  ;;  %v1261_v27 = vpop.f32.mrb[39].mxu0 }
 0x2ec   : > { %v4128_v36 = vpop.eup %4127  ;;  %4147 = vtanh.f32 %v4912_v39  ;;  %v4923_v5 = vadd.f32 %v1348_v15, %v4914_v41  ;;  %v4926_v16 = vadd.f32 %v1261_v27, %v4914_v41  ;;  %v1350_v33 = vpop.f32.mrb[39].mxu1 }
 0x2ed   : > { %v4130_v19 = vpop.eup %4129  ;;  %4149 = vtanh.f32 %v4919_v61  ;;  %v4933_v52 = vadd.f32 %v1350_v33, %v4914_v41 }
 0x2ee   : > { %v4132_v55 = vpop.eup %4131  ;;  %4151 = vtanh.f32 %v4923_v5 }
 0x2ef   : > { %v4134_v57 = vpop.eup %4133  ;;  %4153 = vtanh.f32 %v4926_v16  ;;  %v1419_v45 = vpop.f32.mrb[40].mxu0 }
 0x2f0   : > { %v4136_v6 = vpop.eup %4135  ;;  %4155 = vtanh.f32 %v4933_v52  ;;  %v4939_v23 = vadd.f32 %v1419_v45, %v4867_v14  ;;  %v1508_v7 = vpop.f32.mrb[40].mxu1  ;;  %v3839_v17 = vpack.c.bf16 %v4134_v57, %v4128_v36 }
 0x2f1   : > { %v1421_v24 = vpop.f32.mrb[41].mxu0  ;;  %v4138_v58 = vpop.eup %4137  ;;  %4157 = vtanh.f32 %v4929_v51  ;;  %v4961_v28 = vadd.f32 %v1508_v7, %v4867_v14 }
 0x2f2   : > { %v4943_v59 = vadd.f32 %v1421_v24, %v4867_v14  ;;  %v1510_v60 = vpop.f32.mrb[41].mxu1  ;;  %v4140_v2 = vpop.eup %4139  ;;  %v3837_v25 = vpack.c.bf16 %v4138_v58, %v4130_v19  ;;  %4159 = vtanh.f32 %v4939_v23 }
 0x2f3   : > { %v4946_v8 = vadd.f32 %v1510_v60, %v4867_v14  ;;  %v4142_v62 = vpop.eup %4141  ;;  %v1425_v9 = vpop.f32.mrb[42].mxu0  ;;  %v3845_v40 = vpack.c.bf16 %v4140_v2, %v4132_v55  ;;  %v242_v2 = vld [vmem:[%s6155_s2 + $0x40] sm:$0xff] }
 0x2f4   : > { %v4144_v63 = vpop.eup %4143  ;;  %4161 = vtanh.f32 %v4943_v59  ;;  %v4951_v56 = vadd.f32 %v1425_v9, %v4875_v31  ;;  %v1514_v13 = vpop.f32.mrb[42].mxu1  ;;  %3838 = vmatprep.subr.bf16.mxu0 %v3837_v25  ;;  %v3847_v47 = vpack.c.bf16 %v4136_v6, %v4142_v62 }
 0x2f5   : > { %v1427_v22 = vpop.f32.mrb[43].mxu0  ;;  %v4146_v50 = vpop.eup %4145  ;;  %4163 = vtanh.f32 %v4946_v8  ;;  %v4955_v11 = vadd.f32 %v1514_v13, %v4875_v31  ;;  %3846 = vmatprep.subr.bf16.mxu1 %v3845_v40  ;;  %3840 = vmatpush1.bf16.msra.mxu0 %v3839_v17 }
 0x2f6   : > { %v4958_v12 = vadd.f32 %v1427_v22, %v4875_v31  ;;  %v1516_v20 = vpop.f32.mrb[43].mxu1  ;;  %v4148_v48 = vpop.eup %4147  ;;  %4165 = vtanh.f32 %v4951_v56  ;;  %3848 = vmatpush1.bf16.msra.mxu1 %v3847_v47 }
 0x2f7   : > { %v4965_v30 = vadd.f32 %v1516_v20, %v4875_v31  ;;  %v4150_v49 = vpop.eup %4149  ;;  %4167 = vtanh.f32 %v4955_v11  ;;  %v1431_v1 = vpop.f32.mrb[44].mxu0 }
 0x2f8   : > { %v4152_v43 = vpop.eup %4151  ;;  %4169 = vtanh.f32 %v4958_v12  ;;  %v4970_v32 = vadd.f32 %v1431_v1, %v4885_v18  ;;  %v1520_v37 = vpop.f32.mrb[44].mxu1  ;;  %v3843_v19 = vpack.c.bf16 %v4150_v49, %v4144_v63  ;;  %v244_v1 = vld [vmem:[%s6155_s2 + $0x50] sm:$0xff] }
 0x2f9   : > { %v1433_v26 = vpop.f32.mrb[45].mxu0  ;;  %v4154_v14 = vpop.eup %4153  ;;  %4171 = vtanh.f32 %v4965_v30  ;;  %v4996_v62 = vadd.f32 %v1520_v37, %v4885_v18 }
 0x2fa   : > { %v4974_v10 = vadd.f32 %v1433_v26, %v4885_v18  ;;  %v1522_v31 = vpop.f32.mrb[45].mxu1  ;;  %v4156_v35 = vpop.eup %4155  ;;  %4173 = vtanh.f32 %v4961_v28  ;;  %v3841_v15 = vpack.c.bf16 %v4154_v14, %v4146_v50 }
 0x2fb   : > { %v4978_v42 = vadd.f32 %v1522_v31, %v4885_v18  ;;  %v4158_v27 = vpop.eup %4157  ;;  %4175 = vtanh.f32 %v4970_v32  ;;  %v1437_v36 = vpop.f32.mrb[46].mxu0  ;;  %v3849_v33 = vpack.c.bf16 %v4156_v35, %v4148_v48  ;;  %v243_v18 = vld [vmem:[%s6155_s2 + $0x48] sm:$0xff]  ;;  %v245_v31 = vld [vmem:[%s6155_s2 + $0x58] sm:$0xff] }
 0x2fc   : > { %4177 = vtanh.f32 %v4974_v10  ;;  %v4983_v55 = vadd.f32 %v1437_v36, %v4914_v41  ;;  %v1526_v57 = vpop.f32.mrb[46].mxu1  ;;  %v1439_v45 = vpop.f32.mrb[47].mxu0  ;;  %3842 = vmatprep.subr.bf16.mxu0 %v3841_v15  ;;  %v3851_v6 = vpack.c.bf16 %v4152_v43, %v4158_v27 }
 0x2fd   : > { %v4160_v7 = vpop.eup %4159  ;;  %4179 = vtanh.f32 %v4978_v42  ;;  %v4987_v24 = vadd.f32 %v1526_v57, %v4914_v41  ;;  %v4990_v58 = vadd.f32 %v1439_v45, %v4914_v41  ;;  %v1528_v60 = vpop.f32.mrb[47].mxu1  ;;  %3850 = vmatprep.subr.bf16.mxu1 %v3849_v33  ;;  %3844 = vmatpush1.bf16.msra.mxu0 %v3843_v19  ;;  %v251_v45 = vld [vmem:[%s6157_s4] sm:$0x3] }
 0x2fe   : > { %v4162_v25 = vpop.eup %4161  ;;  %4181 = vtanh.f32 %v4983_v55  ;;  %v5000_v9 = vadd.f32 %v1528_v60, %v4914_v41  ;;  %3852 = vmatpush1.bf16.msra.mxu1 %v3851_v6  ;;  %v4372_v6 = vmov 4  }
 0x2ff   : > { %v4164_v40 = vpop.eup %4163  ;;  %4183 = vtanh.f32 %v4987_v24  ;;  %3993 = vset.pattern.permute.xlu1 %v4372_v6  ;;  %3994 = vset.pattern.permute.xlu0 %v4372_v6 }
 0x300   : > { %v4166_v17 = vpop.eup %4165  ;;  %4185 = vtanh.f32 %v4990_v58  ;;  %3699 = vmatmul.mubr.msk.f32.vlgmr.msra.gmra.mrb[48].mxu0 %vm714_vm2, %v242_v2  ;;  %2013 = vperm.xlu1 %3993, %v251_v45  }
 0x301   : > { %v4168_v63 = vpop.eup %4167  ;;  %4187 = vtanh.f32 %v5000_v9  ;;  %3703 = vmatmul.mubr.msk.f32.vlgmr.msra.gmra.mrb[48].mxu1 %vm714_vm2, %v242_v2  ;;  %1661 = vmatprep.mubr.f32.mxu0 %v4367_v0  ;;  %v3855_v20 = vpack.c.bf16 %v4166_v17, %v4160_v7  ;;  %v5050_v7 = vpop.permute.xlu0 %1564 }
 0x302   : > { %v4170_v41 = vpop.eup %4169  ;;  %4189 = vtanh.f32 %v4996_v62  ;;  %1750 = vmatprep.mubr.f32.mxu1 %v4367_v0 }
 0x303   : > { %v4172_v13 = vpop.eup %4171  ;;  %v3853_v22 = vpack.c.bf16 %v4170_v41, %v4162_v25 }
 0x304   : > { %v4174_v47 = vpop.eup %4173  ;;  %3700 = vmatmul.mubr.msk.f32.gmra.mrb[50].mxu0 %vm714_vm2, %v243_v18  ;;  %v3861_v50 = vpack.c.bf16 %v4172_v13, %v4164_v40 }
 0x305   : > { %v4176_v48 = vpop.eup %4175  ;;  %3704 = vmatmul.mubr.msk.f32.gmra.mrb[50].mxu1 %vm714_vm2, %v243_v18  ;;  %3854 = vmatprep.subr.bf16.mxu0 %v3853_v22  ;;  %v3863_v49 = vpack.c.bf16 %v4168_v63, %v4174_v47 }
 0x306   : > { %v4178_v43 = vpop.eup %4177  ;;  %3862 = vmatprep.subr.bf16.mxu1 %v3861_v50  ;;  %3856 = vmatpush1.bf16.msra.mxu0 %v3855_v20 }
 0x307   : > { %v4180_v37 = vpop.eup %4179  ;;  %3864 = vmatpush1.bf16.msra.mxu1 %v3863_v49  ;;  %1667 = vmatprep.mubr.f32.mxu0 %v4367_v0 }
 0x308   : > { %v4182_v26 = vpop.eup %4181  ;;  %1756 = vmatprep.mubr.f32.mxu1 %v4367_v0  ;;  %3701 = vmatmul.mubr.msk.f32.gmra.mrb[52].mxu0 %vm714_vm2, %v244_v1 }
 0x309   : > { %v4184_v14 = vpop.eup %4183  ;;  %3705 = vmatmul.mubr.msk.f32.gmra.mrb[52].mxu1 %vm714_vm2, %v244_v1  ;;  %1673 = vmatprep.mubr.f32.mxu0 %v4367_v0  ;;  %v3859_v19 = vpack.c.bf16 %v4182_v26, %v4176_v48 }
 0x30a   : > { %v4186_v35 = vpop.eup %4185  ;;  %1762 = vmatprep.mubr.f32.mxu1 %v4367_v0 }
 0x30b   : > { %v4188_v15 = vpop.eup %4187  ;;  %v3857_v27 = vpack.c.bf16 %v4186_v35, %v4178_v43 }
 0x30c   : > { %v4190_v36 = vpop.eup %4189  ;;  %3702 = vmatmul.mubr.msk.f32.gmra.mrb[54].mxu0 %vm714_vm2, %v245_v31  ;;  %v3865_v33 = vpack.c.bf16 %v4188_v15, %v4180_v37 }
 0x30d   : > { %3706 = vmatmul.mubr.msk.f32.gmra.mrb[54].mxu1 %vm714_vm2, %v245_v31  ;;  %3858 = vmatprep.subr.bf16.mxu0 %v3857_v27  ;;  %v3867_v57 = vpack.c.bf16 %v4184_v14, %v4190_v36 }
 0x30e   : > { %3866 = vmatprep.subr.bf16.mxu1 %v3865_v33  ;;  %3860 = vmatpush1.bf16.msra.mxu0 %v3859_v19  ;;  %v5067_v33 = vpop.permute.xlu0 %1576 }
 0x30f   : > { %3868 = vmatpush1.bf16.msra.mxu1 %v3867_v57  ;;  %1833 = vmatprep.mubr.f32.mxu0 %v4367_v0 }
 0x310   : > { %1922 = vmatprep.mubr.f32.mxu1 %v4367_v0 }
 0x311   : > { %3707 = vmatmul.mubr.msk.f32.vlgmr.msra.gmra.mrb[56].mxu0 %vm714_vm2, %v242_v2 }
 0x312   : > { %3711 = vmatmul.mubr.msk.f32.vlgmr.msra.gmra.mrb[56].mxu1 %vm714_vm2, %v242_v2  ;;  %1839 = vmatprep.mubr.f32.mxu0 %v4367_v0  ;;  %v5052_v2 = vpop.permute.xlu1 %1568 }
 0x313   : > { %1928 = vmatprep.mubr.f32.mxu1 %v4367_v0 }
 0x315   : > { %3708 = vmatmul.mubr.msk.f32.gmra.mrb[58].mxu0 %vm714_vm2, %v243_v18 }
 0x316   : > { %3712 = vmatmul.mubr.msk.f32.gmra.mrb[58].mxu1 %vm714_vm2, %v243_v18  ;;  %1845 = vmatprep.mubr.f32.mxu0 %v4367_v0  ;;  %v5061_v43 = vpop.permute.xlu1 %1572 }
 0x317   : > { %1934 = vmatprep.mubr.f32.mxu1 %v4367_v0 }
 0x319   : > { %3709 = vmatmul.mubr.msk.f32.gmra.mrb[60].mxu0 %vm714_vm2, %v244_v1 }
 0x31a   : > { %3713 = vmatmul.mubr.msk.f32.gmra.mrb[60].mxu1 %vm714_vm2, %v244_v1  ;;  %1851 = vmatprep.mubr.f32.mxu0 %v4367_v0 }
 0x31b   : > { %1940 = vmatprep.mubr.f32.mxu1 %v4367_v0 }
 0x31d   : > { %3710 = vmatmul.mubr.msk.f32.gmra.mrb[62].mxu0 %vm714_vm2, %v245_v31 }
 0x31e   : > { %3714 = vmatmul.mubr.msk.f32.gmra.mrb[62].mxu1 %vm714_vm2, %v245_v31  ;;  %2083 = vmatprep.mubr.f32.mxu0 %v4367_v0 }
 0x31f   : > { %2154 = vmatprep.mubr.f32.mxu1 %v4367_v0 }
 0x3d3   : > { %v1657_v60 = vpop.f32.mrb[48].mxu0 }
 0x3d4   : > { %v1658_v25 = vadd.f32 %v1657_v60, %v5050_v7  ;;  %v1746_v40 = vpop.f32.mrb[48].mxu1  ;;  %v1659_v17 = vpop.f32.mrb[49].mxu0 }
 0x3d5   : > { %v1747_v63 = vadd.f32 %v1746_v40, %v5050_v7  ;;  %v1660_v18 = vadd.f32 %v1659_v17, %v5050_v7  ;;  %v1748_v41 = vpop.f32.mrb[49].mxu1 }
 0x3d6   : > { %4191 = vtanh.f32 %v1658_v25  ;;  %v1749_v13 = vadd.f32 %v1748_v41, %v5050_v7 }
 0x3d7   : > { %4193 = vtanh.f32 %v1747_v63  ;;  %v1663_v22 = vpop.f32.mrb[50].mxu0 }
 0x3d8   : > { %4195 = vtanh.f32 %v1660_v18  ;;  %v1664_v47 = vadd.f32 %v1663_v22, %v5052_v2  ;;  %v1752_v50 = vpop.f32.mrb[50].mxu1  ;;  %v1665_v20 = vpop.f32.mrb[51].mxu0 }
 0x3d9   : > { %4197 = vtanh.f32 %v1749_v13  ;;  %v1753_v48 = vadd.f32 %v1752_v50, %v5052_v2  ;;  %v1666_v49 = vadd.f32 %v1665_v20, %v5052_v2  ;;  %v1754_v1 = vpop.f32.mrb[51].mxu1 }
 0x3da   : > { %4199 = vtanh.f32 %v1664_v47  ;;  %v1755_v37 = vadd.f32 %v1754_v1, %v5052_v2 }
 0x3db   : > { %4201 = vtanh.f32 %v1753_v48  ;;  %v1669_v26 = vpop.f32.mrb[52].mxu0 }
 0x3dc   : > { %4203 = vtanh.f32 %v1666_v49  ;;  %v1670_v14 = vadd.f32 %v1669_v26, %v5061_v43  ;;  %v1758_v31 = vpop.f32.mrb[52].mxu1  ;;  %v1671_v35 = vpop.f32.mrb[53].mxu0 }
 0x3dd   : > { %4205 = vtanh.f32 %v1755_v37  ;;  %v1759_v15 = vadd.f32 %v1758_v31, %v5061_v43  ;;  %v1672_v27 = vadd.f32 %v1671_v35, %v5061_v43  ;;  %v1760_v36 = vpop.f32.mrb[53].mxu1 }
 0x3de   : > { %4207 = vtanh.f32 %v1670_v14  ;;  %v1761_v19 = vadd.f32 %v1760_v36, %v5061_v43 }
 0x3df   : > { %4209 = vtanh.f32 %v1759_v15  ;;  %v1675_v57 = vpop.f32.mrb[54].mxu0 }
 0x3e0   : > { %v4192_v45 = vpop.eup %4191  ;;  %4211 = vtanh.f32 %v1672_v27  ;;  %v1676_v6 = vadd.f32 %v1675_v57, %v5067_v33  ;;  %v1764_v60 = vpop.f32.mrb[54].mxu1 }
 0x3e1   : > { %v1677_v25 = vpop.f32.mrb[55].mxu0  ;;  %v4194_v40 = vpop.eup %4193  ;;  %4213 = vtanh.f32 %v1761_v19  ;;  %v1765_v17 = vadd.f32 %v1764_v60, %v5067_v33  ;;  %v1979_v20 = vadd.f32 %v4192_v45, %v4870_v21 }
 0x3e2   : > { %v1678_v63 = vadd.f32 %v1677_v25, %v5067_v33  ;;  %v1766_v18 = vpop.f32.mrb[55].mxu1  ;;  %v4196_v41 = vpop.eup %4195  ;;  %4215 = vtanh.f32 %v1676_v6  ;;  %v1981_v14 = vadd.f32 %v4194_v40, %v4895_v44 }
 0x3e3   : > { %v1767_v13 = vadd.f32 %v1766_v18, %v5067_v33  ;;  %v4198_v22 = vpop.eup %4197  ;;  %4217 = vtanh.f32 %v1765_v17  ;;  %v1980_v36 = vadd.f32 %v4196_v41, %v4873_v4 }
 0x3e4   : > { %v4200_v47 = vpop.eup %4199  ;;  %4219 = vtanh.f32 %v1678_v63  ;;  %v1835_v50 = vpop.f32.mrb[56].mxu0  ;;  %v1982_v60 = vadd.f32 %v4198_v22, %v4878_v46  ;;  %v5090_v22 = vld [vmem:[%s4487_s17] sm:$0x77] }
 0x3e5   : > { %v4202_v48 = vpop.eup %4201  ;;  %4221 = vtanh.f32 %v1767_v13  ;;  %v1836_v49 = vadd.f32 %v1835_v50, %v5050_v7  ;;  %v1924_v1 = vpop.f32.mrb[56].mxu1  ;;  %v1987_v26 = vadd.f32 %v4200_v47, %v4883_v34 }
 0x3e6   : > { %v1837_v37 = vpop.f32.mrb[57].mxu0  ;;  %v4204_v31 = vpop.eup %4203  ;;  %v1925_v35 = vadd.f32 %v1924_v1, %v5050_v7  ;;  %v1989_v21 = vadd.f32 %v4202_v48, %v4889_v53  ;;  %v5097_v48 = vmul.f32 3.1415927, %v5090_v22 }
 0x3e7   : > { %v1838_v15 = vadd.f32 %v1837_v37, %v5050_v7  ;;  %v1926_v27 = vpop.f32.mrb[57].mxu1  ;;  %v4206_v19 = vpop.eup %4205  ;;  %4223 = vtanh.f32 %v1836_v49  ;;  %v1988_v45 = vadd.f32 %v4204_v31, %v4892_v3  ;;  %v3871_v6 = vpack.c.bf16 %v1987_v26, %v1979_v20 }
 0x3e8   : > { %v1927_v57 = vadd.f32 %v1926_v27, %v5050_v7  ;;  %v4208_v34 = vpop.eup %4207  ;;  %4225 = vtanh.f32 %v1925_v35  ;;  %v1841_v44 = vpop.f32.mrb[58].mxu0  ;;  %v1990_v25 = vadd.f32 %v4206_v19, %v4899_v54  ;;  %v3879_v40 = vpack.c.bf16 %v1989_v21, %v1981_v14 }
 0x3e9   : > { %v4210_v17 = vpop.eup %4209  ;;  %4227 = vtanh.f32 %v1838_v15  ;;  %v1842_v4 = vadd.f32 %v1841_v44, %v5052_v2  ;;  %v1930_v53 = vpop.f32.mrb[58].mxu1  ;;  %v3869_v18 = vpack.c.bf16 %v1988_v45, %v1980_v36  ;;  %v5093_v54 = vmul.f32 6.2831855, %v5090_v22 }
 0x3ea   : > { %v1843_v63 = vpop.f32.mrb[59].mxu0  ;;  %v4212_v7 = vpop.eup %4211  ;;  %4229 = vtanh.f32 %v1927_v57  ;;  %v1931_v3 = vadd.f32 %v1930_v53, %v5052_v2  ;;  %v3877_v47 = vpack.c.bf16 %v1990_v25, %v1982_v60  ;;  %v1995_v37 = vadd.f32 %v4208_v34, %v4904_v29  ;;  %v5112_v25 = vld [vmem:[%s4487_s17 + $0x8] sm:$0x77] }
 0x3eb   : > { %v1844_v41 = vadd.f32 %v1843_v63, %v5052_v2  ;;  %v1932_v13 = vpop.f32.mrb[59].mxu1  ;;  %v4214_v46 = vpop.eup %4213  ;;  %4231 = vtanh.f32 %v1842_v4  ;;  %3870 = vmatprep.subr.bf16.mxu0 %v3869_v18  ;;  %v1996_v1 = vadd.f32 %v4212_v7, %v4908_v38  ;;  %v1997_v15 = vadd.f32 %v4210_v17, %v4929_v51 }
 0x3ec   : > { %v1933_v50 = vadd.f32 %v1932_v13, %v5052_v2  ;;  %v4216_v20 = vpop.eup %4215  ;;  %4233 = vtanh.f32 %v1931_v3  ;;  %3878 = vmatprep.subr.bf16.mxu1 %v3877_v47  ;;  %v1847_v49 = vpop.f32.mrb[60].mxu0  ;;  %3872 = vmatpush1.bf16.msra.mxu0 %v3871_v6  ;;  %v1998_v51 = vadd.f32 %v4214_v46, %v4912_v39  ;;  %v2310_v7 = vand.u32 2139095040, %v5093_v54  ;;  %v5126_v47 = vld [vmem:[%s6156_s3] sm:$0x3] }
 0x3ed   : > { %v4218_v26 = vpop.eup %4217  ;;  %4235 = vtanh.f32 %v1844_v41  ;;  %v1848_v14 = vadd.f32 %v1847_v49, %v5061_v43  ;;  %v1936_v31 = vpop.f32.mrb[60].mxu1  ;;  %3880 = vmatpush1.bf16.msra.mxu1 %v3879_v40  ;;  %v2003_v35 = vadd.f32 %v4216_v20, %v4919_v61  ;;  %v5115_v40 = vmul.f32 6.2831855, %v5112_v25 }
 0x3ee   : > { %v1849_v2 = vpop.f32.mrb[61].mxu0  ;;  %v4220_v27 = vpop.eup %4219  ;;  %4237 = vtanh.f32 %v1933_v50  ;;  %v1937_v36 = vadd.f32 %v1936_v31, %v5061_v43  ;;  %v2005_v29 = vadd.f32 %v4218_v26, %v4923_v5  ;;  %v2730_v3 = vand.u32 2139095040, %v5097_v48 }
 0x3ef   : > { %v1850_v38 = vadd.f32 %v1849_v2, %v5061_v43  ;;  %v1938_v21 = vpop.f32.mrb[61].mxu1  ;;  %v4222_v19 = vpop.eup %4221  ;;  %4239 = vtanh.f32 %v1848_v14  ;;  %v2004_v45 = vadd.f32 %v4220_v27, %v4926_v16  ;;  %v3875_v6 = vpack.c.bf16 %v2003_v35, %v1995_v37 }
 0x3f0   : > { %v1939_v57 = vadd.f32 %v1938_v21, %v5061_v43  ;;  %4241 = vtanh.f32 %v1937_v36  ;;  %v1853_v61 = vpop.f32.mrb[62].mxu0  ;;  %v2006_v34 = vadd.f32 %v4222_v19, %v4933_v52  ;;  %v3883_v44 = vpack.c.bf16 %v2005_v29, %v1997_v15 }
 0x3f1   : > { %v4224_v60 = vpop.eup %4223  ;;  %4243 = vtanh.f32 %v1850_v38  ;;  %v1854_v5 = vadd.f32 %v1853_v61, %v5067_v33  ;;  %v1942_v43 = vpop.f32.mrb[62].mxu1  ;;  %v3873_v16 = vpack.c.bf16 %v2004_v45, %v1996_v1  ;;  %v2414_v20 = vand.u32 2139095040, %v5115_v40 }
 0x3f2   : > { %v1855_v17 = vpop.f32.mrb[63].mxu0  ;;  %v4226_v4 = vpop.eup %4225  ;;  %4245 = vtanh.f32 %v1939_v57  ;;  %v1943_v53 = vadd.f32 %v1942_v43, %v5067_v33  ;;  %v3881_v63 = vpack.c.bf16 %v2006_v34, %v1998_v51  ;;  %v1983_v49 = vadd.f32 %v4224_v60, %v4939_v23 }
 0x3f3   : > { %v1856_v39 = vadd.f32 %v1855_v17, %v5067_v33  ;;  %v1944_v52 = vpop.f32.mrb[63].mxu1  ;;  %v4228_v18 = vpop.eup %4227  ;;  %4247 = vtanh.f32 %v1854_v5  ;;  %3874 = vmatprep.subr.bf16.mxu0 %v3873_v16  ;;  %v2311_v37 = vshrl.u32 %v2310_v7, 23  ;;  %v2731_v26 = vshrl.u32 %v2730_v3, 23 }
 0x3f4   : > { %v1945_v41 = vadd.f32 %v1944_v52, %v5067_v33  ;;  %v4230_v13 = vpop.eup %4229  ;;  %4249 = vtanh.f32 %v1943_v53  ;;  %3882 = vmatprep.subr.bf16.mxu1 %v3881_v63  ;;  %3876 = vmatpush1.bf16.msra.mxu0 %v3875_v6  ;;  %v1985_v14 = vadd.f32 %v4226_v4, %v4961_v28  ;;  %v1984_v35 = vadd.f32 %v4228_v18, %v4943_v59 }
 0x3f5   : > { %v4232_v46 = vpop.eup %4231  ;;  %4251 = vtanh.f32 %v1856_v39  ;;  %3884 = vmatpush1.bf16.msra.mxu1 %v3883_v44  ;;  %v1986_v27 = vadd.f32 %v4230_v13, %v4946_v8  ;;  %v2415_v28 = vshrl.u32 %v2414_v20, 23  ;;  %v3719_v29 = vadd.s32 4294967169, %v2311_v37 }
 0x3f6   : > { %v4234_v50 = vpop.eup %4233  ;;  %4253 = vtanh.f32 %v1945_v41  ;;  %v1991_v33 = vadd.f32 %v4232_v46, %v4951_v56  ;;  %v2307_v41 = vand.u32 2147483647, %v5093_v54  ;;  %v6160_v13 = vmov 2102212464  }
 0x3f7   : > { %v4236_v1 = vpop.eup %4235  ;;  %3715 = vmatmul.mubr.msk.f32.vlgmr.msra.gmra.mrb[64].mxu0 %vm714_vm2, %v5126_v47  ;;  %v1993_v31 = vadd.f32 %v4234_v50, %v4955_v11  ;;  %v3723_v61 = vadd.s32 4294967169, %v2415_v28  ;;  %v2317_v51 = vadd.s32 1, %v3719_v29  ;;  %v4374_v50 = vmov 683565275  }
 0x3f8   : > { %v4238_v2 = vpop.eup %4237  ;;  %v1992_v15 = vadd.f32 %v4236_v1, %v4958_v12  ;;  %3716 = vmatmul.mubr.msk.f32.vlgmr.msra.gmra.mrb[64].mxu1 %vm714_vm2, %v5126_v47  ;;  %v3887_v23 = vpack.c.bf16 %v1991_v33, %v1983_v49  ;;  %2225 = vmatprep.mubr.f32.mxu0 %v4367_v0  ;;  %v3735_v12 = vadd.s32 4294967169, %v2731_v26  ;;  %v6166_v49 = vmov 2475754826  }
 0x3f9   : > { %v4240_v56 = vpop.eup %4239  ;;  %v1994_v36 = vadd.f32 %v4238_v2, %v4965_v30  ;;  %v3895_v38 = vpack.c.bf16 %v1993_v31, %v1985_v14  ;;  %2296 = vmatprep.mubr.f32.mxu1 %v4367_v0  ;;  %vm2318_vm3 = vcmp.gt.s32.totalorder %v2317_v51, 0  ;;  %v6162_v37 = vmov 2131351028  }
 0x3fa   : > { %v4242_v11 = vpop.eup %4241  ;;  %v3885_v21 = vpack.c.bf16 %v1992_v15, %v1984_v35  ;;  %v1999_v8 = vadd.f32 %v4240_v56, %v4970_v32  ;;  %v2737_v34 = vadd.s32 1, %v3735_v12  ;;  %v6164_v2 = vmov 920167782  }
 0x3fb   : > { %v4244_v59 = vpop.eup %4243  ;;  %v3893_v19 = vpack.c.bf16 %v1994_v36, %v1986_v27  ;;  %v2001_v44 = vadd.f32 %v4242_v11, %v4996_v62  ;;  %v4378_v11 = vmov 1326507024  }
 0x3fc   : > { %v4246_v57 = vpop.eup %4245  ;;  %3886 = vmatprep.subr.bf16.mxu0 %v3885_v21  ;;  %v2000_v43 = vadd.f32 %v4244_v59, %v4974_v10  ;;  %vm2738_vm4 = vcmp.gt.s32.totalorder %v2737_v34, 0 }
 0x3fd   : > { %v4248_v45 = vpop.eup %4247  ;;  %3894 = vmatprep.subr.bf16.mxu1 %v3893_v19  ;;  %3888 = vmatpush1.bf16.msra.mxu0 %v3887_v23  ;;  %v2002_v4 = vadd.f32 %v4246_v57, %v4978_v42  ;;  %v2739_v62 = vsel %vm2738_vm4, %v2737_v34, 0 }
 0x3fe   : > { %v4250_v6 = vpop.eup %4249  ;;  %3896 = vmatpush1.bf16.msra.mxu1 %v3895_v38  ;;  %v2007_v30 = vadd.f32 %v4248_v45, %v4983_v55  ;;  %v2421_v55 = vadd.s32 1, %v3723_v61  ;;  %v5153_v42 = vand.u32 31, %v2739_v62  ;;  %v5159_v63 = vshrl.u32 %v2739_v62, 5 }
 0x3ff   : > { %v4252_v0 = vpop.eup %4251  ;;  %v2009_v60 = vadd.f32 %v4250_v6, %v4987_v24  ;;  %v2319_v24 = vsel %vm2318_vm3, %v2317_v51, 0  ;;  %v2727_v45 = vand.u32 2147483647, %v5097_v48 }
 0x400   : > { %v4254_v5 = vpop.eup %4253  ;;  %v2008_v17 = vadd.f32 %v4252_v0, %v4990_v58  ;;  %v3891_v16 = vpack.c.bf16 %v2007_v30, %v1999_v8  ;;  %vm2422_vm5 = vcmp.gt.s32.totalorder %v2421_v55, 0  ;;  %v2321_v10 = vand.u32 31, %v2319_v24 }
 0x401   : > { %v2010_v53 = vadd.f32 %v4254_v5, %v5000_v9  ;;  %v3899_v32 = vpack.c.bf16 %v2009_v60, %v2001_v44  ;;  %v5157_v58 = vsel %vm2422_vm5, %v2421_v55, 0  ;;  %v2320_v9 = vshrl.u32 %v2319_v24, 5 }
 0x402   : > { %v3889_v39 = vpack.c.bf16 %v2008_v17, %v2000_v43  ;;  %v5162_v18 = vand.u32 31, %v5157_v58  ;;  %v2322_v7 = vsub.s32 32, %v2321_v10  ;;  %v5165_v3 = vsub.s32 32, %v5153_v42 }
 0x403   : > { %v3897_v52 = vpack.c.bf16 %v2010_v53, %v2002_v4  ;;  %v2333_v46 = vshll.u32 %v6160_v13, %v2321_v10  ;;  %v2324_v20 = vshll.u32 %v4374_v50, %v2321_v10  ;;  %v2327_v1 = vshll.u32 %v6166_v49, %v2321_v10 }
 0x404   : > { %3890 = vmatprep.subr.bf16.mxu0 %v3889_v39  ;;  %v2325_v33 = vshrl.u32 %v6166_v49, %v2322_v7  ;;  %v2328_v26 = vshrl.u32 %v6162_v37, %v2322_v7  ;;  %v2330_v14 = vshll.u32 %v6162_v37, %v2321_v10  ;;  %v2331_v31 = vshrl.u32 %v6160_v13, %v2322_v7 }
 0x405   : > { %3898 = vmatprep.subr.bf16.mxu1 %v3897_v52  ;;  %3892 = vmatpush1.bf16.msra.mxu0 %v3891_v16  ;;  %v2334_v35 = vshrl.u32 %v6164_v2, %v2322_v7  ;;  %v2336_v56 = vshll.u32 %v6164_v2, %v2321_v10  ;;  %v2337_v28 = vshrl.u32 %v4378_v11, %v2322_v7  ;;  %vm2339_vm6 = vcmp.lt.s32.totalorder %v2320_v9, 1 }
 0x406   : > { %3900 = vmatpush1.bf16.msra.mxu1 %v3899_v32  ;;  %v2326_v23 = vor.u32 %v2325_v33, %v2324_v20  ;;  %v2329_v27 = vor.u32 %v2328_v26, %v2327_v1  ;;  %v2332_v36 = vor.u32 %v2331_v31, %v2330_v14  ;;  %vm2340_vm7 = vcmp.lt.s32.totalorder %v2320_v9, 2 }
 0x407   : > { %v2335_v38 = vor.u32 %v2334_v35, %v2333_v46  ;;  %vm2341_vm8 = vcmp.lt.s32.totalorder %v2320_v9, 3  ;;  %vm2342_vm9 = vcmp.lt.s32.totalorder %v2320_v9, 4  ;;  %v2338_v21 = vor.u32 %v2337_v28, %v2336_v56 }
 0x408   : > { %3717 = vmatmul.mubr.msk.f32.vlgmr.msra.gmra.mrb[66].mxu0 %vm714_vm2, %v5126_v47  ;;  %v2347_v59 = vsel %vm2339_vm6, %v2326_v23, %v2329_v27  ;;  %v2351_v12 = vsel %vm2339_vm6, %v2329_v27, %v2332_v36  ;;  %v2744_v6 = vshll.u32 %v4374_v50, %v5153_v42  ;;  %v2323_v61 = vshrl.u32 %v4374_v50, %v2322_v7 }
 0x409   : > { %3718 = vmatmul.mubr.msk.f32.vlgmr.msra.gmra.mrb[66].mxu1 %vm714_vm2, %v5126_v47  ;;  %v2314_v47 = vand.u32 8388607, %v2307_v41  ;;  %v2348_v29 = vsel %vm2342_vm9, %v2335_v38, 920167782  ;;  %v2352_v30 = vsel %vm2342_vm9, %v2338_v21, 1326507024  ;;  %v2743_v0 = vshrl.u32 %v4374_v50, %v5165_v3 }
 0x40a   : > { %v2349_v19 = vsel %vm2341_vm8, %v2332_v36, %v2348_v29  ;;  %v2344_v51 = vsel %vm2342_vm9, %v2332_v36, 2102212464  ;;  %v2353_v34 = vsel %vm2341_vm8, %v2335_v38, %v2352_v30  ;;  %v2343_v5 = vsel %vm2339_vm6, %v2323_v61, %v2326_v23 }
 0x40b   : > { %v2315_v15 = vor.u32 8388608, %v2314_v47  ;;  %v2350_v8 = vsel %vm2340_vm7, %v2347_v59, %v2349_v19  ;;  %v2345_v43 = vsel %vm2341_vm8, %v2329_v27, %v2344_v51  ;;  %v2354_v17 = vsel %vm2340_vm7, %v2351_v12, %v2353_v34 }
 0x40c   : > { %v2734_v16 = vand.u32 8388607, %v2727_v45  ;;  %v2346_v4 = vsel %vm2340_vm7, %v2343_v5, %v2345_v43  ;;  %v2745_v39 = vshrl.u32 %v6166_v49, %v5165_v3  ;;  %v2747_v24 = vshll.u32 %v6166_v49, %v5153_v42 }
 0x40d   : > { %v2355_v57 = vshll.u32 %v2315_v15, 8  ;;  %v2748_v62 = vshrl.u32 %v6162_v37, %v5165_v3  ;;  %v2750_v9 = vshll.u32 %v6162_v37, %v5153_v42  ;;  %v2751_v46 = vshrl.u32 %v6160_v13, %v5165_v3 }
 0x40e   : > { %v2735_v52 = vor.u32 8388608, %v2734_v16  ;;  %v2746_v7 = vor.u32 %v2745_v39, %v2744_v6  ;;  %v2753_v20 = vshll.u32 %v6160_v13, %v5153_v42  ;;  %v2754_v33 = vshrl.u32 %v6164_v2, %v5165_v3 }
 0x40f   : > { %v5191_v44 = vmul.u32.u64.low %v2355_v57, %v2350_v8  ;;  %v5192_v60 = vmul.u32.u64.high %v2355_v57, %v2350_v8, %v5191_v44  ;;  %v5201_v53 = vmul.u32.u64.low %v2355_v57, %v2354_v17  ;;  %v5202_v32 = vmul.u32.u64.high %v2355_v57, %v2354_v17, %v5201_v53 }
 0x410   : > { %v2362_v55 = vmul.u32 %v2355_v57, %v2346_v4  ;;  %v2749_v47 = vor.u32 %v2748_v62, %v2747_v24  ;;  %v2756_v1 = vshll.u32 %v6164_v2, %v5153_v42  ;;  %v2752_v26 = vor.u32 %v2751_v46, %v2750_v9 }
 0x411   : > { %v2365_v10 = vadd.s32 1, %v5192_v60  ;;  %vm2364_vm10 = vc.u32 %v5202_v32, %v5191_v44  ;;  %v2757_v14 = vshrl.u32 %v4378_v11, %v5165_v3  ;;  %vm2759_vm11 = vcmp.lt.s32.totalorder %v5159_v63, 1 }
 0x412   : > { %v2755_v35 = vor.u32 %v2754_v33, %v2753_v20  ;;  %vm2760_vm12 = vcmp.lt.s32.totalorder %v5159_v63, 2  ;;  %vm2761_vm13 = vcmp.lt.s32.totalorder %v5159_v63, 3  ;;  %vm2762_vm14 = vcmp.lt.s32.totalorder %v5159_v63, 4 }
 0x413   : > { %v2366_v31 = vsel %vm2364_vm10, %v2365_v10, %v5192_v60  ;;  %v2758_v23 = vor.u32 %v2757_v14, %v2756_v1  ;;  %v2763_v42 = vsel %vm2759_vm11, %v2743_v0, %v2746_v7  ;;  %v2764_v56 = vsel %vm2762_vm14, %v2752_v26, 2102212464 }
 0x414   : > { %v2367_v15 = vadd.s32 %v2366_v31, %v2362_v55  ;;  %v2767_v27 = vsel %vm2759_vm11, %v2746_v7, %v2749_v47  ;;  %v2768_v36 = vsel %vm2762_vm14, %v2755_v35, 920167782  ;;  %v2771_v38 = vsel %vm2759_vm11, %v2749_v47, %v2752_v26 }
 0x415   : > { %v2765_v3 = vsel %vm2761_vm13, %v2749_v47, %v2764_v56  ;;  %v2769_v21 = vsel %vm2761_vm13, %v2752_v26, %v2768_v36  ;;  %v2772_v59 = vsel %vm2762_vm14, %v2758_v23, 1326507024  ;;  %v2775_v19 = vshll.u32 %v2735_v52, 8 }
 0x416   : > { %v2368_v28 = vadd.s32 536870912, %v2367_v15  ;;  %v2770_v29 = vsel %vm2760_vm12, %v2767_v27, %v2769_v21  ;;  %v2773_v12 = vsel %vm2761_vm13, %v2755_v35, %v2772_v59  ;;  %v2426_v57 = vsub.s32 32, %v5162_v18 }
 0x417   : > { %v2766_v61 = vsel %vm2760_vm12, %v2763_v42, %v2765_v3  ;;  %v2774_v8 = vsel %vm2760_vm12, %v2771_v38, %v2773_v12  ;;  %v2411_v30 = vand.u32 2147483647, %v5115_v40  ;;  %v5248_v5 = vshrl.u32 %v5157_v58, 5 }
 0x418   : > { %v5233_v6 = vshrl.u32 %v2368_v28, 30  ;;  %v5240_v0 = vmul.u32.u64.low %v2775_v19, %v2774_v8  ;;  %v5241_v51 = vmul.u32.u64.high %v2775_v19, %v2774_v8, %v5240_v0  ;;  %v5251_v43 = vmul.f32 3.1415927, %v5112_v25 }
 0x419   : > { %v5243_v34 = vmul.u32.u64.low %v2775_v19, %v2770_v29  ;;  %v5244_v60 = vmul.u32.u64.high %v2775_v19, %v2770_v29, %v5243_v34  ;;  %v2782_v16 = vmul.u32 %v2775_v19, %v2766_v61  ;;  %v2431_v63 = vshll.u32 %v6166_v49, %v5162_v18 }
 0x41a   : > { %v2370_v17 = vshll.u32 %v5233_v6, 30  ;;  %v2432_v4 = vshrl.u32 %v6162_v37, %v2426_v57  ;;  %v2434_v53 = vshll.u32 %v6162_v37, %v5162_v18  ;;  %v2418_v55 = vand.u32 8388607, %v2411_v30 }
 0x41b   : > { %v2435_v58 = vshrl.u32 %v6160_v13, %v2426_v57  ;;  %v2437_v52 = vshll.u32 %v6160_v13, %v5162_v18  ;;  %vm2784_vm15 = vc.u32 %v5241_v51, %v5243_v34  ;;  %v2785_v24 = vadd.s32 1, %v5244_v60 }
 0x41c   : > { %v2371_v39 = vsub.s32 %v2367_v15, %v2370_v17  ;;  %v2428_v62 = vshll.u32 %v4374_v50, %v5162_v18  ;;  %v2429_v10 = vshrl.u32 %v6166_v49, %v2426_v57  ;;  %v2834_v7 = vand.u32 2139095040, %v5251_v43 }
 0x41d   : > { %v2438_v46 = vshrl.u32 %v6164_v2, %v2426_v57  ;;  %v2440_v47 = vshll.u32 %v6164_v2, %v5162_v18  ;;  %v2786_v20 = vsel %vm2784_vm15, %v2785_v24, %v5244_v60  ;;  %v2433_v33 = vor.u32 %v2432_v4, %v2431_v63 }
 0x41e   : > { %v2373_v9 = vsub.s32 0, %v2371_v39  ;;  %v2436_v1 = vor.u32 %v2435_v58, %v2434_v53  ;;  %v2441_v26 = vshrl.u32 %v4378_v11, %v2426_v57  ;;  %v2787_v31 = vadd.s32 %v2786_v20, %v2782_v16 }
 0x41f   : > { %v2439_v35 = vor.u32 %v2438_v46, %v2437_v52  ;;  %vm2443_vm0 = vcmp.lt.s32.totalorder %v5248_v5, 1  ;;  %v2419_v15 = vor.u32 8388608, %v2418_v55  ;;  %v2430_v23 = vor.u32 %v2429_v10, %v2428_v62 }
 0x420   : > { %v3720_v14 = vmin.u32 %v2373_v9, %v2371_v39  ;;  %v2442_v42 = vor.u32 %v2441_v26, %v2440_v47  ;;  %vm2446_vm1 = vcmp.lt.s32.totalorder %v5248_v5, 4  ;;  %v2788_v27 = vadd.s32 536870912, %v2787_v31 }
 0x421   : > { %vm2445_vm2 = vcmp.lt.s32.totalorder %v5248_v5, 3  ;;  %v2452_v18 = vsel %vm2446_vm1, %v2439_v35, 920167782  ;;  %vm2444_vm3 = vcmp.lt.s32.totalorder %v5248_v5, 2  ;;  %v2455_v36 = vsel %vm2443_vm0, %v2433_v33, %v2436_v1 }
 0x422   : > { %v2375_v56 = vclz %v3720_v14  ;;  %v2456_v38 = vsel %vm2446_vm1, %v2442_v42, 1326507024  ;;  %v2835_v28 = vshrl.u32 %v2834_v7, 23  ;;  %v5286_v21 = vshrl.u32 %v2788_v27, 30 }
 0x423   : > { %v2451_v59 = vsel %vm2443_vm0, %v2430_v23, %v2433_v33  ;;  %v2453_v29 = vsel %vm2445_vm2, %v2436_v1, %v2452_v18  ;;  %v2457_v12 = vsel %vm2445_vm2, %v2439_v35, %v2456_v38  ;;  %v2459_v19 = vshll.u32 %v2419_v15, 8 }
 0x424   : > { %v3721_v3 = vadd.s32 4294967294, %v2375_v56  ;;  %v2790_v61 = vshll.u32 %v5286_v21, 30  ;;  %v2458_v8 = vsel %vm2444_vm3, %v2455_v36, %v2457_v12  ;;  %v2363_v0 = vadd.s32 %v5191_v44, %v5202_v32 }
 0x425   : > { %v2427_v17 = vshrl.u32 %v4374_v50, %v2426_v57  ;;  %v2448_v16 = vsel %vm2446_vm1, %v2436_v1, 2102212464  ;;  %v2454_v55 = vsel %vm2444_vm3, %v2451_v59, %v2453_v29  ;;  %v3739_v58 = vadd.s32 4294967169, %v2835_v28  ;;  %v5324_v29 = vld [vmem:[%s4487_s17 + $0x10] sm:$0x77] }
 0x426   : > { %vm3722_vm4 = vcmp.lt.s32.totalorder %v3721_v3, 0  ;;  %v2791_v53 = vsub.s32 %v2787_v31, %v2790_v61  ;;  %v5304_v24 = vmul.u32.u64.low %v2459_v19, %v2458_v8  ;;  %v5305_v62 = vmul.u32.u64.high %v2459_v19, %v2458_v8, %v5304_v24 }
 0x427   : > { %v2378_v60 = vsel %vm3722_vm4, 0, %v3721_v3  ;;  %v2447_v32 = vsel %vm2443_vm0, %v2427_v17, %v2430_v23  ;;  %v2449_v57 = vsel %vm2445_vm2, %v2433_v33, %v2448_v16  ;;  %v2783_v27 = vadd.s32 %v5243_v34, %v5241_v51 }
 0x428   : > { %v2379_v63 = vsub.s32 32, %v2378_v60  ;;  %v2383_v4 = vsub.s32 4294967266, %v2378_v60  ;;  %v2380_v52 = vshll.u32 %v2371_v39, %v2378_v60  ;;  %v2793_v44 = vsub.s32 0, %v2791_v53 }
 0x429   : > { %v5311_v9 = vmul.u32.u64.low %v2459_v19, %v2454_v55  ;;  %v5312_v46 = vmul.u32.u64.high %v2459_v19, %v2454_v55, %v5311_v9  ;;  %v2841_v39 = vadd.s32 1, %v3739_v58  ;;  %v2450_v35 = vsel %vm2444_vm3, %v2447_v32, %v2449_v57 }
 0x42a   : > { %v2381_v10 = vshrl.u32 %v2363_v0, %v2379_v63  ;;  %v2384_v7 = vadd.s32 127, %v2383_v4  ;;  %v3736_v1 = vmin.u32 %v2793_v44, %v2791_v53  ;;  %v2466_v42 = vmul.u32 %v2459_v19, %v2450_v35 }
 0x42b   : > { %vm2468_vm5 = vc.u32 %v5305_v62, %v5311_v9  ;;  %v2469_v33 = vadd.s32 1, %v5312_v46  ;;  %vm2842_vm6 = vcmp.gt.s32.totalorder %v2841_v39, 0  ;;  %v5327_v12 = vmul.f32 6.2831855, %v5324_v29 }
 0x42c   : > { %v2382_v47 = vor.u32 %v2381_v10, %v2380_v52  ;;  %v2385_v20 = vshll.u32 %v2384_v7, 23  ;;  %v2795_v31 = vclz %v3736_v1  ;;  %v2843_v5 = vsel %vm2842_vm6, %v2841_v39, 0 }
 0x42d   : > { %v2470_v18 = vsel %vm2468_vm5, %v2469_v33, %v5312_v46  ;;  %v5330_v19 = vmul.f32 3.1415927, %v5324_v29  ;;  %v2845_v8 = vand.u32 31, %v2843_v5  ;;  %vm2309_vm8 = vcmp.lt.s32.totalorder %v5093_v54, 0 }
 0x42e   : > { %v2386_v26 = vor.u32 4788187, %v2385_v20  ;;  %v2389_v14 = vcvt.s32.f32 %v2382_v47  ;;  %v3737_v23 = vadd.s32 4294967294, %v2795_v31  ;;  %v2471_v59 = vadd.s32 %v2470_v18, %v2466_v42 }
 0x42f   : > { %v2518_v63 = vand.u32 2139095040, %v5327_v12  ;;  %v2938_v4 = vand.u32 2139095040, %v5330_v19  ;;  %vm5345_vm9 = vcmp.le.f32.partialorder %v2307_v41, 0.7853982  ;;  %v2831_v44 = vand.u32 2147483647, %v5251_v43 }
 0x430   : > { %v2387_v15 = vand.u32 2147483647, %v2386_v26  ;;  %vm3738_vm7 = vcmp.lt.s32.totalorder %v3737_v23, 0  ;;  %v2472_v0 = vadd.s32 536870912, %v2471_v59  ;;  %v2846_v32 = vsub.s32 32, %v2845_v8 }
 0x431   : > { %v2798_v36 = vsel %vm3738_vm7, 0, %v3737_v23  ;;  %v2393_v57 = vsub.s32 4, %v5233_v6  ;;  %v5354_v47 = vshrl.u32 %v2843_v5, 5  ;;  %v2813_v39 = vsub.s32 4, %v5286_v21 }
 0x432   : > { %v2390_v56 = vmul.f32 %v2389_v14, %v2387_v15  ;;  %v2799_v38 = vsub.s32 32, %v2798_v36  ;;  %v2800_v28 = vshll.u32 %v2791_v53, %v2798_v36  ;;  %v2803_v3 = vsub.s32 4294967266, %v2798_v36  ;;  %v5338_v53 = vld [vmem:[%s4487_s17 + $0x18] sm:$0x77] }
 0x433   : > { %v5333_v16 = vshrl.u32 %v2472_v0, 30  ;;  %v5341_v55 = vmul.f32 6.2831855, %v5338_v53  ;;  %v2519_v26 = vshrl.u32 %v2518_v63, 23  ;;  %v5361_v14 = vshrl.u32 %v2938_v4, 23 }
 0x434   : > { %v2391_v61 = vxor.u32 2147483648, %v2390_v56  ;;  %v2801_v51 = vshrl.u32 %v2783_v27, %v2799_v38  ;;  %v2804_v34 = vadd.s32 127, %v2803_v3  ;;  %v5367_v35 = vand.u32 8388607, %v2831_v44 }
 0x435   : > { %v2474_v7 = vshll.u32 %v5333_v16, 30  ;;  %v2622_v20 = vand.u32 2139095040, %v5341_v55  ;;  %v2848_v33 = vshll.u32 %v4374_v50, %v2845_v8  ;;  %v2849_v15 = vshrl.u32 %v6166_v49, %v2846_v32 }
 0x436   : > { %v2802_v60 = vor.u32 %v2801_v51, %v2800_v28  ;;  %v2805_v17 = vshll.u32 %v2804_v34, 23  ;;  %v2392_v52 = vsel %vm2309_vm8, %v2391_v61, %v2390_v56  ;;  %v2394_v23 = vsel %vm2309_vm8, %v2393_v57, %v5233_v6 }
 0x437   : > { %v2395_v41 = vsel %vm5345_vm9, %v5093_v54, %v2392_v52  ;;  %v5363_v31 = vsub.s32 %v2471_v59, %v2474_v7  ;;  %vm2729_vm10 = vcmp.lt.s32.totalorder %v5097_v48, 0  ;;  %v2851_v56 = vshll.u32 %v6166_v49, %v2845_v8 }
 0x438   : > { %v2806_v24 = vor.u32 4788187, %v2805_v17  ;;  %v2809_v10 = vcvt.s32.f32 %v2802_v60  ;;  %4255 = vcosq.f32 %v2395_v41  ;;  %v2852_v27 = vshrl.u32 %v6162_v37, %v2846_v32 }
 0x439   : > { %4257 = vsinq.f32 %v2395_v41  ;;  %v5377_v18 = vshrl.u32 %v2622_v20, 23  ;;  %vm5381_vm11 = vcmp.le.f32.partialorder %v2727_v45, 0.7853982  ;;  %v2814_v5 = vsel %vm2729_vm10, %v2813_v39, %v5286_v21 }
 0x43a   : > { %v2807_v46 = vand.u32 2147483647, %v2806_v24  ;;  %v2854_v6 = vshll.u32 %v6162_v37, %v2845_v8  ;;  %v2855_v38 = vshrl.u32 %v6160_v13, %v2846_v32  ;;  %v2396_v28 = vsel %vm5345_vm9, 0, %v2394_v23 }
 0x43b   : > { %v3280_v59 = vmul.f32 26.4, %v5090_v22  ;;  %v2477_v61 = vsub.s32 0, %v5363_v31  ;;  %v2839_v51 = vor.u32 8388608, %v5367_v35  ;;  %v2847_v45 = vshrl.u32 %v4374_v50, %v2846_v32 }
 0x43c   : > { %v2810_v1 = vmul.f32 %v2809_v10, %v2807_v46  ;;  %v2850_v34 = vor.u32 %v2849_v15, %v2848_v33  ;;  %v5394_v0 = vadd.s32 4294967169, %v2519_v26  ;;  %v2816_v21 = vsel %vm5381_vm11, 0, %v2814_v5 }
 0x43d   : > { %v2467_v60 = vadd.s32 %v5311_v9, %v5305_v62  ;;  %v2857_v17 = vshll.u32 %v6160_v13, %v2845_v8  ;;  %v2858_v63 = vshrl.u32 %v6164_v2, %v2846_v32  ;;  %v2400_v4 = vadd.s32 3, %v2396_v28 }
 0x43e   : > { %v2811_v42 = vxor.u32 2147483648, %v2810_v1  ;;  %v2853_v52 = vor.u32 %v2852_v27, %v2851_v56  ;;  %v2856_v24 = vor.u32 %v2855_v38, %v2854_v6  ;;  %4259 = vtanh.f32 %v3280_v59 }
 0x43f   : > { %v3724_v10 = vmin.u32 %v2477_v61, %v5363_v31  ;;  %v2860_v7 = vshll.u32 %v6164_v2, %v2845_v8  ;;  %v2861_v57 = vshrl.u32 %v4378_v11, %v2846_v32  ;;  %v2820_v46 = vadd.s32 3, %v2816_v21 }
 0x440   : > { %v2812_v3 = vsel %vm2729_vm10, %v2811_v42, %v2810_v1  ;;  %v3288_v62 = vmul.f32 4.0, %v5090_v22  ;;  %v3292_v9 = vsub.f32 1.0, %v5090_v22  ;;  %v2497_v41 = vsub.s32 4, %v5333_v16 }
 0x441   : > { %v2815_v58 = vsel %vm5381_vm11, %v5097_v48, %v2812_v3  ;;  %v2859_v20 = vor.u32 %v2858_v63, %v2857_v17  ;;  %vm2863_vm12 = vcmp.lt.s32.totalorder %v5354_v47, 1  ;;  %vm2864_vm13 = vcmp.lt.s32.totalorder %v5354_v47, 2 }
 0x442   : > { %4261 = vcosq.f32 %v2815_v58  ;;  %v4256_v1 = vpop.eup %4255  ;;  %v2401_v39 = vand.u32 3, %v2400_v4  ;;  %v2479_v26 = vclz %v3724_v10  ;;  %vm2866_vm14 = vcmp.lt.s32.totalorder %v5354_v47, 4 }
 0x443   : > { %4263 = vsinq.f32 %v2815_v58  ;;  %v4258_v8 = vpop.eup %4257  ;;  %vm2413_vm15 = vcmp.lt.s32.totalorder %v5115_v40, 0  ;;  %v2862_v32 = vor.u32 %v2861_v57, %v2860_v7  ;;  %vm2865_vm0 = vcmp.lt.s32.totalorder %v5354_v47, 3 }
 0x444   : > { %v2867_v22 = vsel %vm2863_vm12, %v2847_v45, %v2850_v34  ;;  %v5418_v33 = vand.u32 3, %v2820_v46  ;;  %v3296_v15 = vmul.f32 %v3292_v9, %v3288_v62  ;;  %v3725_v23 = vadd.s32 4294967294, %v2479_v26 }
 0x445   : > { %v5423_v42 = vsel %vm2413_vm15, %v2497_v41, %v5333_v16  ;;  %v2407_v56 = vxor.u32 2147483648, %v4256_v1  ;;  %v2868_v27 = vsel %vm2866_vm14, %v2856_v24, 2102212464  ;;  %v2871_v36 = vsel %vm2863_vm12, %v2850_v34, %v2853_v52 }
 0x446   : > { %v2872_v5 = vsel %vm2866_vm14, %v2859_v20, 920167782  ;;  %vm2399_vm1 = vweird.f32 %v5093_v54  ;;  %v2404_v6 = vxor.u32 2147483648, %v4258_v8  ;;  %vm2406_vm2 = vcmp.eq.s32.totalorder %v2401_v39, 2 }
 0x447   : > { %vm3726_vm3 = vcmp.lt.s32.totalorder %v3725_v23, 0  ;;  %vm2402_vm4 = vcmp.lt.s32.totalorder %v2401_v39, 2  ;;  %vm2403_vm5 = vcmp.eq.s32.totalorder %v2401_v39, 0  ;;  %v3187_v38 = vlaneseq }
 0x448   : > { %v2482_v16 = vsel %vm3726_vm3, 0, %v3725_v23  ;;  %vm2823_vm6 = vcmp.eq.s32.totalorder %v5418_v33, 0  ;;  %v3759_v28 = vrot.slane %v3296_v15, 9  ;;  %v2873_v61 = vsel %vm2865_vm0, %v2856_v24, %v2872_v5  ;;  %v4260_v45 = vpop.eup %4259 }
 0x449   : > { %v2483_v3 = vsub.s32 32, %v2482_v16  ;;  %v2487_v59 = vsub.s32 4294967266, %v2482_v16  ;;  %v2408_v34 = vsel %vm2406_vm2, %v2407_v56, %v4258_v8  ;;  %v2484_v21 = vshll.u32 %v5363_v31, %v2482_v16 }
 0x44a   : > { %v2875_v17 = vsel %vm2863_vm12, %v2853_v52, %v2856_v24  ;;  %v2876_v63 = vsel %vm2866_vm14, %v2862_v32, 1326507024  ;;  %v2405_v4 = vsel %vm2403_vm5, %v4256_v1, %v2404_v6  ;;  %vm5444_vm7 = vcmp.le.f32.partialorder %v2411_v30, 0.7853982 }
 0x44b   : > { %v2485_v58 = vshrl.u32 %v2467_v60, %v2483_v3  ;;  %v2488_v10 = vadd.s32 127, %v2487_v59  ;;  %v2877_v7 = vsel %vm2865_vm0, %v2859_v20, %v2876_v63  ;;  %v2869_v31 = vsel %vm2865_vm0, %v2853_v52, %v2868_v27 }
 0x44c   : > { %v4262_v57 = vpop.eup %4261  ;;  %v2874_v24 = vsel %vm2864_vm13, %v2871_v36, %v2873_v61  ;;  %v2878_v60 = vsel %vm2864_vm13, %v2875_v17, %v2877_v7  ;;  %v2879_v62 = vshll.u32 %v2839_v51, 8  ;;  %v3188_v41 = vshrl.u32 %v3187_v38, 7 }
 0x44d   : > { %v4264_v9 = vpop.eup %4263  ;;  %v3316_v20 = vmul.f32 %v4260_v45, %v3759_v28  ;;  %v3763_v1 = vrot.slane %v3296_v15, 10  ;;  %v2489_v30 = vshll.u32 %v2488_v10, 23  ;;  %v2409_v26 = vsel %vm2402_vm4, %v2405_v4, %v2408_v34 }
 0x44e   : > { %v2486_v8 = vor.u32 %v2485_v58, %v2484_v21  ;;  %v5457_v32 = vmul.u32.u64.low %v2879_v62, %v2878_v60  ;;  %v5458_v23 = vmul.u32.u64.high %v2879_v62, %v2878_v60, %v5457_v32  ;;  %vm2819_vm8 = vweird.f32 %v5097_v48 }
 0x44f   : > { %v2490_v52 = vor.u32 4788187, %v2489_v30  ;;  %v2870_v56 = vsel %vm2864_vm13, %v2867_v22, %v2869_v31  ;;  %v5463_v27 = vmul.u32.u64.low %v2879_v62, %v2874_v24  ;;  %v5464_v35 = vmul.u32.u64.high %v2879_v62, %v2874_v24, %v5463_v27 }
 0x450   : > { %v2824_v51 = vxor.u32 2147483648, %v4264_v9  ;;  %vm2826_vm9 = vcmp.eq.s32.totalorder %v5418_v33, 2  ;;  %v2827_v15 = vxor.u32 2147483648, %v4262_v57  ;;  %v2410_v39 = vsel %vm2399_vm1, nan, %v2409_v26 }
 0x451   : > { %v3332_v36 = vmul.f32 %v3763_v1, %v3316_v20  ;;  %v5470_v5 = vsub.s32 0, %v3188_v41  ;;  %v2525_v6 = vadd.s32 1, %v5394_v0  ;;  %v2491_v38 = vand.u32 2147483647, %v2490_v52 }
 0x452   : > { %v2493_v16 = vcvt.s32.f32 %v2486_v8  ;;  %v2886_v47 = vmul.u32 %v2879_v62, %v2870_v56  ;;  %vm2888_vm10 = vc.u32 %v5458_v23, %v5463_v27  ;;  %vm2822_vm11 = vcmp.lt.s32.totalorder %v5418_v33, 2 }
 0x453   : > { %v5476_v22 = vsub.s32 4, %v3188_v41  ;;  %v4379_v28 = vmov 1983009808   ;;  %v2889_v54 = vadd.s32 1, %v5464_v35  ;;  %v2825_v59 = vsel %vm2823_vm6, %v4262_v57, %v2824_v51 }
 0x454   : > { %v3527_v3 = vunpack.c.l.s4 %v4379_v28  ;;  %v2828_v0 = vsel %vm2826_vm9, %v2827_v15, %v4264_v9  ;;  %v3751_v61 = vrot.slane %v2410_v39, 9  ;;  %vm2526_vm12 = vcmp.gt.s32.totalorder %v2525_v6, 0 }
 0x455   : > { %v5483_v45 = vsub.s32 1, %v3188_v41  ;;  %v3420_v34 = vsub.f32 1.0, %v3332_v36  ;;  %v2500_v21 = vsel %vm5444_vm7, 0, %v5423_v42  ;;  %v2890_v17 = vsel %vm2888_vm10, %v2889_v54, %v5464_v35 }
 0x456   : > { %v5489_v63 = vsub.s32 5, %v3188_v41  ;;  %v3343_v4 = vrot.slane %v3332_v36, %v5470_v5  ;;  %v2494_v58 = vmul.f32 %v2493_v16, %v2491_v38  ;;  %v2891_v10 = vadd.s32 %v2890_v17, %v2886_v47 }
 0x457   : > { %v2829_v7 = vsel %vm2822_vm11, %v2825_v59, %v2828_v0  ;;  %v3347_v57 = vrot.slane %v3332_v36, %v5476_v22  ;;  %v3528_v31 = vunpack.c.0.s8 %v3527_v3  ;;  %v2527_v24 = vsel %vm2526_vm12, %v2525_v6, 0 }
 0x458   : > { %v5495_v60 = vmul.f32 %v3751_v61, %v2410_v39  ;;  %v2504_v62 = vadd.s32 3, %v2500_v21  ;;  %v2892_v9 = vadd.s32 536870912, %v2891_v10  ;;  %v2529_v42 = vand.u32 31, %v2527_v24 }
 0x459   : > { %v5498_v20 = vrot.slane %v3420_v34, %v5470_v5  ;;  %v2515_v1 = vand.u32 2147483647, %v5327_v12  ;;  %v5502_v30 = vadd.s32 4294967169, %v5361_v14  ;;  %v5505_v33 = vadd.s32 4294967169, %v5377_v18 }
 0x45a   : > { %v2830_v26 = vsel %vm2819_vm8, nan, %v2829_v7  ;;  %v2495_v8 = vxor.u32 2147483648, %v2494_v58  ;;  %v5509_v32 = vshrl.u32 %v2892_v9, 30  ;;  %v2530_v52 = vsub.s32 32, %v2529_v42 }
 0x45b   : > { %v5512_v56 = vrot.slane %v3343_v4, %v5470_v5  ;;  %v5515_v35 = vrot.slane %v3347_v57, %v5470_v5  ;;  %v5518_v51 = vrot.slane %v3420_v34, %v5476_v22  ;;  %v5520_v14 = vsub.s32 %v3528_v31, %v3188_v41 }
 0x45c   : > { %v3190_v18 = vrot.slane %v5495_v60, %v5483_v45  ;;  %v3194_v48 = vrot.slane %v5495_v60, %v5489_v63  ;;  %v5526_v15 = vand.u32 3, %v2504_v62  ;;  %v2894_v39 = vshll.u32 %v5509_v32, 30 }
 0x45d   : > { %v3755_v36 = vrot.slane %v2830_v26, 9  ;;  %v3471_v6 = vrot.slane %v5498_v20, %v5470_v5  ;;  %v3281_v38 = vmul.f32 26.4, %v5112_v25  ;;  %v2522_v41 = vand.u32 8388607, %v2515_v1 }
 0x45e   : > { %v2496_v16 = vsel %vm2413_vm15, %v2495_v8, %v2494_v58  ;;  %v5536_v47 = vsub.s32 %v2891_v10, %v2894_v39  ;;  %v2532_v28 = vshll.u32 %v4374_v50, %v2529_v42  ;;  %v2533_v3 = vshrl.u32 %v6166_v49, %v2530_v52 }
 0x45f   : > { %v2535_v54 = vshll.u32 %v6166_v49, %v2529_v42  ;;  %v2536_v59 = vshrl.u32 %v6162_v37, %v2530_v52  ;;  %v2541_v0 = vshll.u32 %v6160_v13, %v2529_v42  ;;  %v2542_v61 = vshrl.u32 %v6164_v2, %v2530_v52 }
 0x460   : > { %v2897_v34 = vsub.s32 0, %v5536_v47  ;;  %v5545_v21 = vshrl.u32 %v2527_v24, 5  ;;  %v2538_v17 = vshll.u32 %v6162_v37, %v2529_v42  ;;  %v2539_v4 = vshrl.u32 %v6160_v13, %v2530_v52 }
 0x461   : > { %v5549_v58 = vmul.f32 %v3755_v36, %v2830_v26  ;;  %4265 = vtanh.f32 %v3281_v38  ;;  %v3289_v7 = vmul.f32 4.0, %v5112_v25  ;;  %v2499_v57 = vsel %vm5444_vm7, %v5115_v40, %v2496_v16 }
 0x462   : > { %v3740_v31 = vmin.u32 %v2897_v34, %v5536_v47  ;;  %v2523_v24 = vor.u32 8388608, %v2522_v41  ;;  %v2534_v62 = vor.u32 %v2533_v3, %v2532_v28  ;;  %vm2833_vm13 = vcmp.lt.s32.totalorder %v5251_v43, 0 }
 0x463   : > { %v2537_v9 = vor.u32 %v2536_v59, %v2535_v54  ;;  %v2543_v8 = vor.u32 %v2542_v61, %v2541_v0  ;;  %v2544_v26 = vshll.u32 %v6164_v2, %v2529_v42  ;;  %v2545_v39 = vshrl.u32 %v4378_v11, %v2530_v52 }
 0x464   : > { %v2899_v36 = vclz %v3740_v31  ;;  %v3293_v38 = vsub.f32 1.0, %v5112_v25  ;;  %v2540_v10 = vor.u32 %v2539_v4, %v2538_v17  ;;  %vm2547_vm14 = vcmp.lt.s32.totalorder %v5545_v21, 1 }
 0x465   : > { %4267 = vcosq.f32 %v2499_v57  ;;  %v2887_v46 = vadd.s32 %v5463_v27, %v5458_v23  ;;  %v2531_v41 = vshrl.u32 %v4374_v50, %v2530_v52  ;;  %vm2549_vm15 = vcmp.lt.s32.totalorder %v5545_v21, 3 }
 0x466   : > { %vm3271_vm0 = vcmask 1040384   ;;  %vm5569_vm1 = vcmp.le.f32.partialorder %v2831_v44, 0.7853982  ;;  %v3741_v16 = vadd.s32 4294967294, %v2899_v36  ;;  %vm2548_vm2 = vcmp.lt.s32.totalorder %v5545_v21, 2 }
 0x467   : > { %vm2550_vm3 = vcmp.lt.s32.totalorder %v5545_v21, 4  ;;  %v2563_v25 = vshll.u32 %v2523_v24, 8  ;;  %v2546_v28 = vor.u32 %v2545_v39, %v2544_v26  ;;  %v2555_v27 = vsel %vm2547_vm14, %v2534_v62, %v2537_v9 }
 0x468   : > { %v2552_v23 = vsel %vm2550_vm3, %v2540_v10, 2102212464  ;;  %v2556_v52 = vsel %vm2550_vm3, %v2543_v8, 920167782  ;;  %vm3742_vm4 = vcmp.lt.s32.totalorder %v3741_v16, 0  ;;  %v2917_v44 = vsub.s32 4, %v5509_v32 }
 0x469   : > { %v5582_v3 = vmul.f32 %v3293_v38, %v3289_v7  ;;  %v2557_v54 = vsel %vm2549_vm15, %v2540_v10, %v2556_v52  ;;  %v2902_v59 = vsel %vm3742_vm4, 0, %v3741_v16  ;;  %v2551_v0 = vsel %vm2547_vm14, %v2531_v41, %v2534_v62 }
 0x46a   : > { %v2558_v61 = vsel %vm2548_vm2, %v2555_v27, %v2557_v54  ;;  %v6159_v34 = vand.u32 2147483647, %v5330_v19  ;;  %v2903_v17 = vsub.s32 32, %v2902_v59  ;;  %v2904_v4 = vshll.u32 %v5536_v47, %v2902_v59 }
 0x46b   : > { %v2907_v31 = vsub.s32 4294967266, %v2902_v59  ;;  %v2553_v7 = vsel %vm2549_vm15, %v2537_v9, %v2552_v23  ;;  %v4266_v24 = vpop.eup %4265  ;;  %v2559_v26 = vsel %vm2547_vm14, %v2537_v9, %v2540_v10  ;;  %v2560_v39 = vsel %vm2550_vm3, %v2546_v28, 1326507024 }
 0x46c   : > { %v5598_v62 = vmul.u32.u64.low %v2563_v25, %v2558_v61  ;;  %v5599_v36 = vmul.u32.u64.high %v2563_v25, %v2558_v61, %v5598_v62  ;;  %v2905_v38 = vshrl.u32 %v2887_v46, %v2903_v17  ;;  %v2918_v47 = vsel %vm2833_vm13, %v2917_v44, %v5509_v32 }
 0x46d   : > { %v2908_v41 = vadd.s32 127, %v2907_v31  ;;  %v2561_v16 = vsel %vm2549_vm15, %v2543_v8, %v2560_v39  ;;  %v3234_v23 = vrot.slane %v5549_v58, %v5483_v45  ;;  %v3760_v10 = vrot.slane %v5582_v3, 9 }
 0x46e   : > { %v2562_v9 = vsel %vm2548_vm2, %v2559_v26, %v2561_v16  ;;  %v2945_v28 = vadd.s32 1, %v5502_v30  ;;  %4269 = vsinq.f32 %v2499_v57  ;;  %v2906_v46 = vor.u32 %v2905_v38, %v2904_v4 }
 0x46f   : > { %v2909_v27 = vshll.u32 %v2908_v41, 23  ;;  %v2554_v52 = vsel %vm2548_vm2, %v2551_v0, %v2553_v7  ;;  %v5615_v32 = vpop.eup %4267  ;;  %v2920_v8 = vsel %vm5569_vm1, 0, %v2918_v47  ;;  %v2942_v59 = vand.u32 8388607, %v6159_v34 }
 0x470   : > { %v5619_v44 = vmul.u32.u64.low %v2563_v25, %v2562_v9  ;;  %v5620_v54 = vmul.u32.u64.high %v2563_v25, %v2562_v9, %v5619_v44  ;;  %v2913_v17 = vcvt.s32.f32 %v2906_v46  ;;  %v2573_v30 = vadd.s32 1, %v5599_v36 }
 0x471   : > { %v2910_v61 = vor.u32 4788187, %v2909_v27  ;;  %vm2946_vm5 = vcmp.gt.s32.totalorder %v2945_v28, 0  ;;  %v3238_v21 = vrot.slane %v5549_v58, %v5489_v63  ;;  %v5631_v57 = vsel %vm3271_vm0, %v3190_v18, %v3234_v23 }
 0x472   : > { %v2570_v0 = vmul.u32 %v2563_v25, %v2554_v52  ;;  %v2947_v4 = vsel %vm2946_vm5, %v2945_v28, 0  ;;  %v5633_v7 = vmul.f32 %v4266_v24, %v3760_v10  ;;  %v3764_v26 = vrot.slane %v5582_v3, 10 }
 0x473   : > { %v2911_v31 = vand.u32 2147483647, %v2910_v61  ;;  %v2949_v39 = vand.u32 31, %v2947_v4  ;;  %v2511_v38 = vxor.u32 2147483648, %v5615_v32  ;;  %v2924_v41 = vadd.s32 3, %v2920_v8 }
 0x474   : > { %vm2572_vm6 = vc.u32 %v5620_v54, %v5598_v62  ;;  %v2943_v47 = vor.u32 8388608, %v2942_v59  ;;  %vm2510_vm7 = vcmp.eq.s32.totalorder %v5526_v15, 2  ;;  %vm2507_vm8 = vcmp.eq.s32.totalorder %v5526_v15, 0 }
 0x475   : > { %v2914_v16 = vmul.f32 %v2913_v17, %v2911_v31  ;;  %v2574_v18 = vsel %vm2572_vm6, %v2573_v30, %v5599_v36  ;;  %v2950_v25 = vsub.s32 32, %v2949_v39  ;;  %v2952_v23 = vshll.u32 %v4374_v50, %v2949_v39 }
 0x476   : > { %v2575_v24 = vadd.s32 %v2574_v18, %v2570_v0  ;;  %v2948_v10 = vshrl.u32 %v2947_v4, 5  ;;  %v2955_v9 = vshll.u32 %v6166_v49, %v2949_v39  ;;  %v2961_v28 = vshll.u32 %v6160_v13, %v2949_v39 }
 0x477   : > { %v2915_v46 = vxor.u32 2147483648, %v2914_v16  ;;  %v2953_v27 = vshrl.u32 %v6166_v49, %v2950_v25  ;;  %v2956_v52 = vshrl.u32 %v6162_v37, %v2950_v25  ;;  %v2958_v8 = vshll.u32 %v6162_v37, %v2949_v39 }
 0x478   : > { %v2576_v44 = vadd.s32 536870912, %v2575_v24  ;;  %v2959_v36 = vshrl.u32 %v6160_v13, %v2950_v25  ;;  %v2962_v59 = vshrl.u32 %v6164_v2, %v2950_v25  ;;  %v2964_v61 = vshll.u32 %v6164_v2, %v2949_v39  ;;  %v4270_v17 = vpop.eup %4269 }
 0x479   : > { %v2916_v30 = vsel %vm2833_vm13, %v2915_v46, %v2914_v16  ;;  %v2954_v0 = vor.u32 %v2953_v27, %v2952_v23  ;;  %v2957_v4 = vor.u32 %v2956_v52, %v2955_v9  ;;  %v2965_v31 = vshrl.u32 %v4378_v11, %v2950_v25 }
 0x47a   : > { %vm2506_vm9 = vcmp.lt.s32.totalorder %v5526_v15, 2  ;;  %v2919_v18 = vsel %vm5569_vm1, %v5251_v43, %v2916_v30  ;;  %v2577_v34 = vshrl.u32 %v2576_v44, 30  ;;  %v2951_v13 = vshrl.u32 %v4374_v50, %v2950_v25 }
 0x47b   : > { %v2963_v37 = vor.u32 %v2962_v59, %v2961_v28  ;;  %4271 = vcosq.f32 %v2919_v18  ;;  %v2960_v39 = vor.u32 %v2959_v36, %v2958_v8  ;;  %v2966_v2 = vor.u32 %v2965_v31, %v2964_v61 }
 0x47c   : > { %vm2967_vm10 = vcmp.lt.s32.totalorder %v2948_v10, 1  ;;  %v2508_v49 = vxor.u32 2147483648, %v4270_v17  ;;  %4273 = vsinq.f32 %v2919_v18  ;;  %v2578_v16 = vshll.u32 %v2577_v34, 30 }
 0x47d   : > { %vm2969_vm11 = vcmp.lt.s32.totalorder %v2948_v10, 3  ;;  %vm2968_vm12 = vcmp.lt.s32.totalorder %v2948_v10, 2  ;;  %vm2970_vm13 = vcmp.lt.s32.totalorder %v2948_v10, 4  ;;  %v2975_v23 = vsel %vm2967_vm10, %v2954_v0, %v2957_v4 }
 0x47e   : > { %v2983_v9 = vshll.u32 %v2943_v47, 8  ;;  %vm2503_vm14 = vweird.f32 %v5115_v40  ;;  %vm2517_vm15 = vcmp.lt.s32.totalorder %v5327_v12, 0  ;;  %v5662_v42 = vsub.s32 %v2575_v24, %v2578_v16 }
 0x47f   : > { %v2971_v25 = vsel %vm2967_vm10, %v2951_v13, %v2954_v0  ;;  %v2972_v28 = vsel %vm2970_vm13, %v2960_v39, 2102212464  ;;  %v2976_v46 = vsel %vm2970_vm13, %v2963_v37, 920167782  ;;  %v2979_v8 = vsel %vm2967_vm10, %v2957_v4, %v2960_v39 }
 0x480   : > { %v2973_v27 = vsel %vm2969_vm11, %v2957_v4, %v2972_v28  ;;  %v2977_v52 = vsel %vm2969_vm11, %v2960_v39, %v2976_v46  ;;  %v2980_v44 = vsel %vm2970_vm13, %v2966_v2, 1326507024  ;;  %v2512_v47 = vsel %vm2510_vm7, %v2511_v38, %v4270_v17 }
 0x481   : > { %v5670_v36 = vand.u32 3, %v2924_v41  ;;  %v2581_v59 = vsub.s32 0, %v5662_v42  ;;  %v2978_v24 = vsel %vm2968_vm12, %v2975_v23, %v2977_v52  ;;  %v2509_v13 = vsel %vm2507_vm8, %v5615_v32, %v2508_v49 }
 0x482   : > { %v2981_v61 = vsel %vm2969_vm11, %v2963_v37, %v2980_v44  ;;  %v5678_v30 = vmul.u32.u64.low %v2983_v9, %v2978_v24  ;;  %v5679_v0 = vmul.u32.u64.high %v2983_v9, %v2978_v24, %v5678_v30  ;;  %vm5684_vm1 = vcmp.le.f32.partialorder %v2515_v1, 0.7853982 }
 0x483   : > { %v3728_v38 = vmin.u32 %v2581_v59, %v5662_v42  ;;  %v2974_v41 = vsel %vm2968_vm12, %v2971_v25, %v2973_v27  ;;  %v2982_v17 = vsel %vm2968_vm12, %v2979_v8, %v2981_v61  ;;  %v3282_v49 = vmul.f32 26.4, %v5324_v29 }
 0x484   : > { %v5699_v37 = vsel %vm3271_vm0, %v3194_v48, %v3238_v21  ;;  %v2601_v1 = vsub.s32 4, %v2577_v34  ;;  %v5701_v32 = vmul.u32.u64.low %v2983_v9, %v2982_v17  ;;  %v5702_v4 = vmul.u32.u64.high %v2983_v9, %v2982_v17, %v5701_v32 }
 0x485   : > { %v5708_v10 = vmul.f32 %v3471_v6, %v5631_v57  ;;  %vm2926_vm2 = vcmp.lt.s32.totalorder %v5670_v36, 2  ;;  %v5714_v58 = vmul.f32 %v3764_v26, %v5633_v7  ;;  %v2583_v60 = vclz %v3728_v38  ;;  %v4272_v48 = vpop.eup %4271 }
 0x486   : > { %v2513_v21 = vsel %vm2506_vm9, %v2509_v13, %v2512_v47  ;;  %vm2930_vm3 = vcmp.eq.s32.totalorder %v5670_v36, 2  ;;  %v2990_v31 = vmul.u32 %v2983_v9, %v2974_v41  ;;  %v2993_v18 = vadd.s32 1, %v5679_v0  ;;  %v4274_v20 = vpop.eup %4273 }
 0x487   : > { %v3729_v6 = vadd.s32 4294967294, %v2583_v60  ;;  %4275 = vtanh.f32 %v3282_v49  ;;  %v3290_v57 = vmul.f32 4.0, %v5324_v29  ;;  %v3294_v39 = vsub.f32 1.0, %v5324_v29 }
 0x488   : > { %vm2923_vm4 = vweird.f32 %v5251_v43  ;;  %v2931_v3 = vxor.u32 2147483648, %v4272_v48  ;;  %v2571_v7 = vadd.s32 %v5598_v62, %v5620_v54  ;;  %v2602_v15 = vsel %vm2517_vm15, %v2601_v1, %v2577_v34 }
 0x489   : > { %vm2992_vm5 = vc.u32 %v5702_v4, %v5678_v30  ;;  %v2928_v26 = vxor.u32 2147483648, %v4274_v20  ;;  %vm3730_vm6 = vcmp.lt.s32.totalorder %v3729_v6, 0  ;;  %v2629_v23 = vadd.s32 1, %v5505_v33 }
 0x48a   : > { %v2994_v16 = vsel %vm2992_vm5, %v2993_v18, %v5679_v0  ;;  %v2514_v29 = vsel %vm2503_vm14, nan, %v2513_v21  ;;  %vm2927_vm7 = vcmp.eq.s32.totalorder %v5670_v36, 0  ;;  %v2586_v9 = vsel %vm3730_vm6, 0, %v3729_v6 }
 0x48b   : > { %v2995_v25 = vadd.s32 %v2994_v16, %v2990_v31  ;;  %v2587_v62 = vsub.s32 32, %v2586_v9  ;;  %v2588_v54 = vshll.u32 %v5662_v42, %v2586_v9  ;;  %v2591_v34 = vsub.s32 4294967266, %v2586_v9 }
 0x48c   : > { %v2619_v28 = vand.u32 2147483647, %v5341_v55  ;;  %v2932_v46 = vsel %vm2930_vm3, %v2931_v3, %v4274_v20  ;;  %v2604_v27 = vsel %vm5684_vm1, 0, %v2602_v15  ;;  %v5740_v52 = vmul.f32 %v3294_v39, %v3290_v57 }
 0x48d   : > { %v2996_v33 = vadd.s32 536870912, %v2995_v25  ;;  %v2929_v40 = vsel %vm2927_vm7, %v4272_v48, %v2928_v26  ;;  %v2589_v8 = vshrl.u32 %v2571_v7, %v2587_v62  ;;  %v2592_v44 = vadd.s32 127, %v2591_v34 }
 0x48e   : > { %vm2630_vm8 = vcmp.gt.s32.totalorder %v2629_v23, 0  ;;  %v3752_v47 = vrot.slane %v2514_v29, 9  ;;  %v3421_v59 = vsub.f32 1.0, %v5714_v58  ;;  %v3351_v13 = vrot.slane %v5714_v58, %v5470_v5 }
 0x48f   : > { %v5743_v42 = vshrl.u32 %v2996_v33, 30  ;;  %v2631_v24 = vsel %vm2630_vm8, %v2629_v23, 0  ;;  %v2590_v61 = vor.u32 %v2589_v8, %v2588_v54  ;;  %v2593_v0 = vshll.u32 %v2592_v44, 23 }
 0x490   : > { %v2608_v38 = vadd.s32 3, %v2604_v27  ;;  %v2933_v41 = vsel %vm2926_vm2, %v2929_v40, %v2932_v46  ;;  %v3761_v49 = vrot.slane %v5740_v52, 9  ;;  %v2633_v1 = vand.u32 31, %v2631_v24 }
 0x491   : > { %v2998_v17 = vshll.u32 %v5743_v42, 30  ;;  %v4276_v32 = vpop.eup %4275  ;;  %v3355_v60 = vrot.slane %v5714_v58, %v5476_v22  ;;  %v2594_v48 = vor.u32 4788187, %v2593_v0  ;;  %v2597_v21 = vcvt.s32.f32 %v2590_v61 }
 0x492   : > { %v5755_v31 = vand.u32 8388607, %v2619_v28  ;;  %v5757_v18 = vmul.f32 %v3752_v47, %v2514_v29  ;;  %v5762_v36 = vrot.slane %v3421_v59, %v5470_v5  ;;  %v2634_v6 = vsub.s32 32, %v2633_v1 }
 0x493   : > { %v5764_v20 = vsub.s32 %v2995_v25, %v2998_v17  ;;  %v5768_v57 = vsel %vm2923_vm4, nan, %v2933_v41  ;;  %v2595_v39 = vand.u32 2147483647, %v2594_v48  ;;  %v5770_v3 = vand.u32 3, %v2608_v38 }
 0x494   : > { %v3765_v7 = vrot.slane %v5740_v52, 10  ;;  %v2991_v15 = vadd.s32 %v5678_v30, %v5702_v4  ;;  %v5776_v16 = vmul.f32 %v4276_v32, %v3761_v49  ;;  %v2636_v23 = vshll.u32 %v4374_v50, %v2633_v1 }
 0x495   : > { %v3001_v26 = vsub.s32 0, %v5764_v20  ;;  %v2598_v29 = vmul.f32 %v2597_v21, %v2595_v39  ;;  %v2627_v9 = vor.u32 8388608, %v5755_v31  ;;  %v6180_v43 = vmov 2475754826  }
 0x496   : > { %v2637_v25 = vshrl.u32 %v6180_v43, %v2634_v6  ;;  %v2639_v62 = vshll.u32 %v6180_v43, %v2633_v1  ;;  %v3756_v54 = vrot.slane %v5768_v57, 9  ;;  %v6181_v46 = vmov 2131351028  }
 0x497   : > { %v3744_v34 = vmin.u32 %v3001_v26, %v5764_v20  ;;  %v2640_v27 = vshrl.u32 %v6181_v46, %v2634_v6  ;;  %v2642_v30 = vshll.u32 %v6181_v46, %v2633_v1  ;;  %v2599_v4 = vxor.u32 2147483648, %v2598_v29 }
 0x498   : > { %vm2937_vm9 = vcmp.lt.s32.totalorder %v5330_v19, 0  ;;  %v2632_v33 = vshrl.u32 %v2631_v24, 5  ;;  %v6182_v40 = vmov 2102212464   ;;  %v3021_v61 = vsub.s32 4, %v5743_v42 }
 0x499   : > { %v2643_v8 = vshrl.u32 %v6182_v40, %v2634_v6  ;;  %v2645_v44 = vshll.u32 %v6182_v40, %v2633_v1  ;;  %v3003_v47 = vclz %v3744_v34  ;;  %v2635_v0 = vshrl.u32 %v4374_v50, %v2634_v6 }
 0x49a   : > { %v2638_v38 = vor.u32 %v2637_v25, %v2636_v23  ;;  %v2600_v41 = vsel %vm2517_vm15, %v2599_v4, %v2598_v29  ;;  %v2641_v17 = vor.u32 %v2640_v27, %v2639_v62  ;;  %v6183_v32 = vmov 920167782  }
 0x49b   : > { %v2644_v49 = vor.u32 %v2643_v8, %v2642_v30  ;;  %v2646_v48 = vshrl.u32 %v6183_v32, %v2634_v6  ;;  %v2603_v24 = vsel %vm5684_vm1, %v5327_v12, %v2600_v41  ;;  %v3745_v21 = vadd.s32 4294967294, %v3003_v47 }
 0x49c   : > { %v2648_v31 = vshll.u32 %v6183_v32, %v2633_v1  ;;  %v2649_v39 = vshrl.u32 %v4378_v11, %v2634_v6  ;;  %4277 = vcosq.f32 %v2603_v24  ;;  %vm2651_vm10 = vcmp.lt.s32.totalorder %v2632_v33, 1 }
 0x49d   : > { %v2647_v26 = vor.u32 %v2646_v48, %v2645_v44  ;;  %vm2652_vm11 = vcmp.lt.s32.totalorder %v2632_v33, 2  ;;  %4279 = vsinq.f32 %v2603_v24  ;;  %vm3746_vm12 = vcmp.lt.s32.totalorder %v3745_v21, 0 }
 0x49e   : > { %v2650_v23 = vor.u32 %v2649_v39, %v2648_v31  ;;  %vm2653_vm13 = vcmp.lt.s32.totalorder %v2632_v33, 3  ;;  %v6184_v29 = vand.u32 2147483647, %v5330_v19  ;;  %v3006_v2 = vsel %vm3746_vm12, 0, %v3745_v21 }
 0x49f   : > { %vm2654_vm15 = vcmp.lt.s32.totalorder %v2632_v33, 4  ;;  %v2655_v1 = vsel %vm2651_vm10, %v2635_v0, %v2638_v38  ;;  %v2659_v6 = vsel %vm2651_vm10, %v2638_v38, %v2641_v17  ;;  %v3007_v62 = vsub.s32 32, %v3006_v2 }
 0x4a0   : > { %vm5801_vm14 = vcmp.le.f32.partialorder %v6184_v29, 0.7853982  ;;  %v3008_v34 = vshll.u32 %v5764_v20, %v3006_v2  ;;  %v3011_v27 = vsub.s32 4294967266, %v3006_v2  ;;  %v2656_v30 = vsel %vm2654_vm15, %v2644_v49, 2102212464 }
 0x4a1   : > { %v2657_v4 = vsel %vm2653_vm13, %v2641_v17, %v2656_v30  ;;  %v2660_v8 = vsel %vm2654_vm15, %v2647_v26, 920167782  ;;  %v2663_v44 = vsel %vm2651_vm10, %v2641_v17, %v2644_v49  ;;  %v2664_v47 = vsel %vm2654_vm15, %v2650_v23, 1326507024 }
 0x4a2   : > { %v3009_v41 = vshrl.u32 %v2991_v15, %v3007_v62  ;;  %v3012_v48 = vadd.s32 127, %v3011_v27  ;;  %v3022_v24 = vsel %vm2937_vm9, %v3021_v61, %v5743_v42  ;;  %v2661_v0 = vsel %vm2653_vm13, %v2644_v49, %v2660_v8 }
 0x4a3   : > { %v2662_v38 = vsel %vm2652_vm11, %v2659_v6, %v2661_v0  ;;  %v2665_v20 = vsel %vm2653_vm13, %v2647_v26, %v2664_v47  ;;  %v2667_v21 = vshll.u32 %v2627_v9, 8  ;;  %v5817_v31 = vmul.f32 3.1415927, %v5338_v53 }
 0x4a4   : > { %v3010_v39 = vor.u32 %v3009_v41, %v3008_v34  ;;  %v3013_v29 = vshll.u32 %v3012_v48, 23  ;;  %v2658_v17 = vsel %vm2652_vm11, %v2655_v1, %v2657_v4  ;;  %v2666_v15 = vsel %vm2652_vm11, %v2663_v44, %v2665_v20 }
 0x4a5   : > { %v5821_v23 = vmul.u32.u64.low %v2667_v21, %v2666_v15  ;;  %v5822_v2 = vmul.u32.u64.high %v2667_v21, %v2666_v15, %v5821_v23  ;;  %v5824_v42 = vmul.u32.u64.low %v2667_v21, %v2662_v38  ;;  %v5825_v61 = vmul.u32.u64.high %v2667_v21, %v2662_v38, %v5824_v42 }
 0x4a6   : > { %v5831_v9 = vrot.slane %v3421_v59, %v5476_v22  ;;  %v3014_v53 = vor.u32 4788187, %v3013_v29  ;;  %v3017_v49 = vcvt.s32.f32 %v3010_v39  ;;  %v5836_v26 = vmul.f32 %v3765_v7, %v5776_v16  ;;  %v4278_v33 = vpop.eup %4277 }
 0x4a7   : > { %v3180_v1 = vmul.f32 %v3756_v54, %v5768_v57  ;;  %v3198_v6 = vrot.slane %v5757_v18, %v5483_v45  ;;  %vm2607_vm1 = vweird.f32 %v5327_v12  ;;  %vm2614_vm2 = vcmp.eq.s32.totalorder %v5770_v3, 2  ;;  %v4280_v62 = vpop.eup %4279 }
 0x4a8   : > { %v3042_v59 = vand.u32 2139095040, %v5817_v31  ;;  %v2615_v34 = vxor.u32 2147483648, %v4278_v33  ;;  %v3015_v27 = vand.u32 2147483647, %v3014_v53  ;;  %v3024_v52 = vsel %vm5801_vm14, 0, %v3022_v24 }
 0x4a9   : > { %v2674_v7 = vmul.u32 %v2667_v21, %v2658_v17  ;;  %vm2611_vm3 = vcmp.eq.s32.totalorder %v5770_v3, 0  ;;  %v2612_v16 = vxor.u32 2147483648, %v4280_v62  ;;  %vm2676_vm4 = vc.u32 %v5822_v2, %v5824_v42 }
 0x4aa   : > { %v2677_v57 = vadd.s32 1, %v5825_v61  ;;  %vm2610_vm5 = vcmp.lt.s32.totalorder %v5770_v3, 2  ;;  %v3018_v54 = vmul.f32 %v3017_v49, %v3015_v27  ;;  %v3422_v30 = vsub.f32 1.0, %v5836_v26 }
 0x4ab   : > { %v3043_v4 = vshrl.u32 %v3042_v59, 23  ;;  %v3242_v8 = vrot.slane %v3180_v1, %v5483_v45  ;;  %v2616_v44 = vsel %vm2614_vm2, %v2615_v34, %v4280_v62  ;;  %v3028_v47 = vadd.s32 3, %v3024_v52 }
 0x4ac   : > { %v2678_v41 = vsel %vm2676_vm4, %v2677_v57, %v5825_v61  ;;  %v2613_v48 = vsel %vm2611_vm3, %v4278_v33, %v2612_v16  ;;  %v3019_v24 = vxor.u32 2147483648, %v3018_v54  ;;  %v3202_v20 = vrot.slane %v5757_v18, %v5489_v63 }
 0x4ad   : > { %v2679_v0 = vadd.s32 %v2678_v41, %v2674_v7  ;;  %v3747_v38 = vadd.s32 4294967169, %v3043_v4  ;;  %v3246_v21 = vrot.slane %v3180_v1, %v5489_v63  ;;  %v3479_v39 = vrot.slane %v5762_v36, %v5470_v5 }
 0x4ae   : > { %v3039_v29 = vand.u32 2147483647, %v5817_v31  ;;  %v3483_v17 = vrot.slane %v5831_v9, %v5470_v5  ;;  %v3020_v15 = vsel %vm2937_vm9, %v3019_v24, %v3018_v54  ;;  %v3274_v53 = vsel %vm3271_vm0, %v3198_v6, %v3242_v8 }
 0x4af   : > { %v2680_v23 = vadd.s32 536870912, %v2679_v0  ;;  %v3049_v61 = vadd.s32 1, %v3747_v38  ;;  %v2617_v18 = vsel %vm2610_vm5, %v2613_v48, %v2616_v44  ;;  %v3023_v49 = vsel %vm5801_vm14, %v5330_v19, %v3020_v15 }
 0x4b0   : > { %v5875_v36 = vrot.slane %v3422_v30, %v5470_v5  ;;  %4281 = vcosq.f32 %v3023_v49  ;;  %v5877_v9 = vand.u32 3, %v3028_v47  ;;  %v3275_v1 = vsel %vm3271_vm0, %v3202_v20, %v3246_v21 }
 0x4b1   : > { %v5879_v33 = vshrl.u32 %v2680_v23, 30  ;;  %vm3050_vm6 = vcmp.gt.s32.totalorder %v3049_v61, 0  ;;  %4283 = vsinq.f32 %v3023_v49  ;;  %v3046_v3 = vand.u32 8388607, %v3039_v29 }
 0x4b2   : > { %v3051_v6 = vsel %vm3050_vm6, %v3049_v61, 0  ;;  %v6187_v25 = vrot.slane %v5518_v51, %v5470_v5  ;;  %v3391_v62 = vrot.slane %v3351_v13, %v5470_v5  ;;  %v2618_v34 = vsel %vm2607_vm1, nan, %v2617_v18 }
 0x4b3   : > { %v2682_v27 = vshll.u32 %v5879_v33, 30  ;;  %v3395_v52 = vrot.slane %v3355_v60, %v5470_v5  ;;  %v3359_v51 = vrot.slane %v5836_v26, %v5470_v5  ;;  %v3053_v7 = vand.u32 31, %v3051_v6 }
 0x4b4   : > { %v5888_v59 = vmul.f32 %v6187_v25, %v5699_v37  ;;  %v3487_v37 = vrot.slane %v5875_v36, %v5470_v5  ;;  %v3502_v16 = vmul.f32 %v3479_v39, %v3274_v53  ;;  %v5905_v57 = vmul.f32 %v3483_v17, %v3275_v1 }
 0x4b5   : > { %vm3030_vm7 = vcmp.lt.s32.totalorder %v5877_v9, 2  ;;  %v5908_v12 = vsub.s32 %v2679_v0, %v2682_v27  ;;  %vm3027_vm8 = vweird.f32 %v5330_v19  ;;  %v3753_v13 = vrot.slane %v2618_v34, 9 }
 0x4b6   : > { %v3047_v54 = vor.u32 8388608, %v3046_v3  ;;  %v5911_v58 = vshrl.u32 %v3051_v6, 5  ;;  %v3054_v60 = vsub.s32 32, %v3053_v7  ;;  %vm3031_vm9 = vcmp.eq.s32.totalorder %v5877_v9, 0 }
 0x4b7   : > { %vm3034_vm10 = vcmp.eq.s32.totalorder %v5877_v9, 2  ;;  %v5917_v4 = vadd.s32 %v5824_v42, %v5822_v2  ;;  %v2685_v8 = vsub.s32 0, %v5908_v12  ;;  %v3056_v44 = vshll.u32 %v4374_v50, %v3053_v7  ;;  %v5929_v42 = vpop.permute.xlu1 %2013 }
 0x4b8   : > { %v3057_v47 = vshrl.u32 %v6180_v43, %v3054_v60  ;;  %v3059_v41 = vshll.u32 %v6180_v43, %v3053_v7  ;;  %v3060_v48 = vshrl.u32 %v6181_v46, %v3054_v60  ;;  %v3062_v0 = vshll.u32 %v6181_v46, %v3053_v7 }
 0x4b9   : > { %v3732_v24 = vmin.u32 %v2685_v8, %v5908_v12  ;;  %v3063_v38 = vshrl.u32 %v6182_v40, %v3054_v60  ;;  %v3363_v2 = vrot.slane %v5836_v26, %v5476_v22  ;;  %v5931_v20 = vmul.f32 %v3753_v13, %v2618_v34 }
 0x4ba   : > { %vm3071_vm11 = vcmp.lt.s32.totalorder %v5911_v58, 1  ;;  %v5934_v21 = vshll.u32 %v3047_v54, 8  ;;  %v5939_v43 = vrot.slane %v3422_v30, %v5476_v22  ;;  %v4282_v39 = vpop.eup %4281  ;;  %v3055_v17 = vshrl.u32 %v4374_v50, %v3054_v60 }
 0x4bb   : > { %v2687_v46 = vclz %v3732_v24  ;;  %v3065_v15 = vshll.u32 %v6182_v40, %v3053_v7  ;;  %v3066_v23 = vshrl.u32 %v6183_v32, %v3054_v60  ;;  %v4284_v61 = vpop.eup %4283  ;;  %v3035_v18 = vxor.u32 2147483648, %v4282_v39 }
 0x4bc   : > { %v3058_v49 = vor.u32 %v3057_v47, %v3056_v44  ;;  %v3061_v1 = vor.u32 %v3060_v48, %v3059_v41  ;;  %v3068_v3 = vshll.u32 %v6183_v32, %v3053_v7  ;;  %v3032_v34 = vxor.u32 2147483648, %v4284_v61 }
 0x4bd   : > { %v3733_v27 = vadd.s32 4294967294, %v2687_v46  ;;  %v3064_v13 = vor.u32 %v3063_v38, %v3062_v0  ;;  %v3036_v8 = vsel %vm3034_vm10, %v3035_v18, %v4284_v61  ;;  %v3069_v44 = vshrl.u32 %v4378_v11, %v3054_v60 }
 0x4be   : > { %v3033_v7 = vsel %vm3031_vm9, %v4282_v39, %v3032_v34  ;;  %vm3074_vm13 = vcmp.lt.s32.totalorder %v5911_v58, 4  ;;  %v3206_v9 = vrot.slane %v5931_v20, %v5483_v45  ;;  %vm3073_vm14 = vcmp.lt.s32.totalorder %v5911_v58, 3 }
 0x4bf   : > { %vm3734_vm12 = vcmp.lt.s32.totalorder %v3733_v27, 0  ;;  %v3037_v24 = vsel %vm3030_vm7, %v3033_v7, %v3036_v8  ;;  %vm3072_vm15 = vcmp.lt.s32.totalorder %v5911_v58, 2  ;;  %v3083_v34 = vsel %vm3071_vm11, %v3061_v1, %v3064_v13 }
 0x4c0   : > { %v5958_v0 = vsel %vm3734_vm12, 0, %v3733_v27  ;;  %v3038_v11 = vsel %vm3027_vm8, nan, %v3037_v24  ;;  %v3491_v58 = vrot.slane %v5939_v43, %v5470_v5  ;;  %vm2621_vm2 = vcmp.lt.s32.totalorder %v5341_v55, 0 }
 0x4c1   : > { %v3757_v61 = vrot.slane %v3038_v11, 9  ;;  %vm6055_vm3 = vcmp.le.f32.partialorder %v2619_v28, 0.7853982  ;;  %vm3041_vm5 = vcmp.lt.s32.totalorder %v5817_v31, 0  ;;  %vm6071_vm6 = vcmp.le.f32.partialorder %v3039_v29, 0.7853982 }
 0x4c2   : > { %vm2711_vm10 = vweird.f32 %v5341_v55 }
 0x4ca   : > { %v2085_v53 = vpop.f32.mrb[64].mxu0 }
 0x4cb   : > { %v2156_v6 = vpop.f32.mrb[64].mxu1  ;;  %v2086_v25 = vadd.f32 %v2085_v53, %v5929_v42  ;;  %v2087_v30 = vpop.f32.mrb[65].mxu0 }
 0x4cc   : > { %v2088_v50 = vadd.f32 %v2087_v30, %v5929_v42  ;;  %v2157_v40 = vadd.f32 %v2156_v6, %v5929_v42  ;;  %v2158_v54 = vpop.f32.mrb[65].mxu1 }
 0x4cd   : > { %v3412_v47 = vmul.f32 %v5512_v56, %v2086_v25  ;;  %v2159_v32 = vadd.f32 %v2158_v54, %v5929_v42  ;;  %v3067_v56 = vor.u32 %v3066_v23, %v3065_v15  ;;  %v3070_v15 = vor.u32 %v3069_v44, %v3068_v3 }
 0x4ce   : > { %v3413_v41 = vmul.f32 %v5515_v35, %v2088_v50  ;;  %v3414_v48 = vmul.f32 %v3391_v62, %v2157_v40  ;;  %v2695_v62 = vsub.s32 4294967266, %v5958_v0  ;;  %v3075_v23 = vsel %vm3071_vm11, %v3055_v17, %v3058_v49 }
 0x4cf   : > { %v3508_v38 = vadd.f32 %v5708_v10, %v3412_v47  ;;  %v3415_v46 = vmul.f32 %v3395_v52, %v2159_v32  ;;  %v3076_v10 = vsel %vm3074_vm13, %v3064_v13, 2102212464  ;;  %v3181_v52 = vmul.f32 %v3757_v61, %v3038_v11 }
 0x4d0   : > { %v3509_v60 = vadd.f32 %v5888_v59, %v3413_v41  ;;  %v3510_v39 = vadd.f32 %v3502_v16, %v3414_v48  ;;  %v2691_v16 = vsub.s32 32, %v5958_v0  ;;  %v3077_v53 = vsel %vm3073_vm14, %v3061_v1, %v3076_v10 }
 0x4d1   : > { %v3511_v35 = vadd.f32 %v5905_v57, %v3415_v46  ;;  %v3079_v57 = vsel %vm3071_vm11, %v3058_v49, %v3061_v1  ;;  %v3080_v18 = vsel %vm3074_vm13, %v3067_v56, 920167782  ;;  %v3210_v3 = vrot.slane %v5931_v20, %v5489_v63 }
 0x4d2   : > { %v3524_v19 = vcombine.low %v3508_v38, %v3509_v60  ;;  %v3250_v6 = vrot.slane %v3181_v52, %v5483_v45  ;;  %v2696_v25 = vadd.s32 127, %v2695_v62  ;;  %v3081_v30 = vsel %vm3073_vm14, %v3064_v13, %v3080_v18 }
 0x4d3   : > { %v3525_v59 = vcombine.low %v3510_v39, %v3511_v35  ;;  %v3082_v27 = vsel %vm3072_vm15, %v3079_v57, %v3081_v30  ;;  %v3084_v50 = vsel %vm3074_vm13, %v3070_v15, 1326507024  ;;  %v2692_v20 = vshll.u32 %v5908_v12, %v5958_v0 }
 0x4d4   : > { %v3532_v17 = vrot.slane %v3524_v19, %v5520_v14  ;;  %v2693_v40 = vshrl.u32 %v5917_v4, %v2691_v16  ;;  %v3078_v1 = vsel %vm3072_vm15, %v3075_v23, %v3077_v53  ;;  %v3085_v13 = vsel %vm3073_vm14, %v3067_v56, %v3084_v50 }
 0x4d5   : > { %v3539_v49 = vrot.slane %v3525_v59, %v5520_v14  ;;  %v3086_v54 = vsel %vm3072_vm15, %v3083_v34, %v3085_v13  ;;  %v6008_v8 = vmul.u32.u64.low %v5934_v21, %v3082_v27  ;;  %v6009_v44 = vmul.u32.u64.high %v5934_v21, %v3082_v27, %v6008_v8 }
 0x4d6   : > { %v3254_v47 = vrot.slane %v3181_v52, %v5489_v63  ;;  %v3276_v32 = vsel %vm3271_vm0, %v3206_v9, %v3250_v6  ;;  %v2697_v12 = vshll.u32 %v2696_v25, 23  ;;  %v3399_v41 = vrot.slane %v3359_v51, %v5470_v5 }
 0x4d7   : > { %v6014_v4 = vmul.u32.u64.low %v5934_v21, %v3086_v54  ;;  %v6015_v7 = vmul.u32.u64.high %v5934_v21, %v3086_v54, %v6014_v4  ;;  %v3540_v48 = vcombine.low %v3532_v17, %v3539_v49  ;;  %v3094_v0 = vmul.u32 %v5934_v21, %v3078_v1 }
 0x4d8   : > { %v3277_v38 = vsel %vm3271_vm0, %v3210_v3, %v3254_v47  ;;  %v3504_v11 = vmul.f32 %v3487_v37, %v3276_v32  ;;  %v3097_v60 = vadd.s32 1, %v6009_v44  ;;  %v3403_v51 = vrot.slane %v3363_v2, %v5470_v5  ;;  %v4302_v32 = vld [vmem:[%s4487_s17 + $0x18] sm:$0x77]  ;;  %s3772_s17 = sshll.u32 %s4432_s22, 8  ;;  %s4380_s22 = smov [#allocation2]  }
 0x4d9   : > { %3560 = vst [vmem:[%s6034_s16] sm:$0xff] %v3540_v48  ;;  %v2694_v43 = vor.u32 %v2693_v40, %v2692_v20  ;;  %v2698_v61 = vor.u32 4788187, %v2697_v12  ;;  %vm3096_vm1 = vc.u32 %v6015_v7, %v6008_v8  ;;  %v3505_v62 = vmul.f32 %v3491_v58, %v3277_v38  ;;  %s6108_s30 = scalar_lea.hbm %s6158_s5, %s3772_s17  ;;  %s4307_s8 = sshll.u32 %s4380_s22, 4  ;;  %s4308_s8 = int_to_ptr.vmem [resolvable:$false] %s4307_s8 }
 0x4da   : > { %v3098_v35 = vsel %vm3096_vm1, %v3097_v60, %v6009_v44  ;;  %v2705_v27 = vsub.s32 4, %v5879_v33  ;;  %v3095_v20 = vadd.s32 %v6008_v8, %v6015_v7  ;;  %v3283_v12 = vmul.f32 26.4, %v4302_v32  ;;  %s4309_s9 = scalar_lea.vmem %s4308_s8, 512  ;;  %p4310_p0 = scmp.lt.s32.totalorder %s6110_s23, %s4308_s8 }
 0x4db   : > { %v2227_v24 = vpop.f32.mrb[66].mxu0  ;;  %v3099_v26 = vadd.s32 %v3098_v35, %v3094_v0  ;;  %v2699_v52 = vand.u32 2147483647, %v2698_v61  ;;  %v2701_v15 = vcvt.s32.f32 %v2694_v43  ;;  %v3291_v38 = vmul.f32 4.0, %v4302_v32  ;;  %p4311_p1 = scmp.lt.s32.totalorder %s4309_s9, %s4303_s7 }
 0x4dc   : > { %v2228_v46 = vadd.f32 %v2227_v24, %v5929_v42  ;;  %v2298_v56 = vpop.f32.mrb[66].mxu1  ;;  %v2229_v39 = vpop.f32.mrb[67].mxu0  ;;  %v2706_v54 = vsel %vm2621_vm2, %v2705_v27, %v5879_v33  ;;  %vm3131_vm14 = vweird.f32 %v5817_v31 }
 0x4dd   : > { %v6038_v21 = vadd.f32 %v2298_v56, %v5929_v42  ;;  %v2300_v36 = vpop.f32.mrb[67].mxu1  ;;  %v2230_v9 = vadd.f32 %v2229_v39, %v5929_v42  ;;  %v3100_v59 = vadd.s32 536870912, %v3099_v26  ;;  %v2702_v53 = vmul.f32 %v2701_v15, %v2699_v52  ;;  %p4312_p2 = por %p4311_p1, %p4310_p0 }
 0x4de   : > { %v3416_v37 = vmul.f32 %v3399_v41, %v2228_v46  ;;  %v6044_v2 = vadd.f32 %v2300_v36, %v5929_v42  ;;  %v2708_v4 = vsel %vm6055_vm3, 0, %v2706_v54  ;;  %v3295_v46 = vsub.f32 1.0, %v4302_v32 }
 0x4df   : > { %v3417_v19 = vmul.f32 %v3403_v51, %v2230_v9  ;;  %v3101_v57 = vshrl.u32 %v3100_v59, 30  ;;  %v2703_v6 = vxor.u32 2147483648, %v2702_v53  ;;  %v2712_v7 = vadd.s32 3, %v2708_v4  ;;  %p4313_p3 = pnand %p4312_p2, %p4306_p13 }
 0x4e0   : > { %v6046_v10 = vadd.f32 %v3504_v11, %v3416_v37  ;;  %v3299_v61 = vmul.f32 %v3295_v46, %v3291_v38 }
 0x4e1   : > { %v6048_v16 = vadd.f32 %v3505_v62, %v3417_v19  ;;  %v3102_v18 = vshll.u32 %v3101_v57, 30  ;;  %v2704_v34 = vsel %vm2621_vm2, %v2703_v6, %v2702_v53  ;;  %v3125_v0 = vsub.s32 4, %v3101_v57 }
 0x4e2   : > { %v2707_v50 = vsel %vm6055_vm3, %v5341_v55, %v2704_v34  ;;  %v2713_v60 = vand.u32 3, %v2712_v7  ;;  %v3762_v29 = vrot.slane %v3299_v61, 9 }
 0x4e3   : > { %v3541_v23 = vcombine.low %v6046_v10, %v6048_v16  ;;  %v3103_v3 = vsub.s32 %v3099_v26, %v3102_v18  ;;  %4285 = vcosq.f32 %v2707_v50  ;;  %v3126_v43 = vsel %vm3041_vm5, %v3125_v0, %v3101_v57 }
 0x4e4   : > { %4287 = vsinq.f32 %v2707_v50  ;;  %vm2715_vm7 = vcmp.eq.s32.totalorder %v2713_v60, 0  ;;  %vm2718_vm8 = vcmp.eq.s32.totalorder %v2713_v60, 2  ;;  %v3128_v62 = vsel %vm6071_vm6, 0, %v3126_v43 }
 0x4e5   : > { %v3105_v25 = vsub.s32 0, %v3103_v3  ;;  %4289 = vtanh.f32 %v3283_v12  ;;  %vm2714_vm9 = vcmp.lt.s32.totalorder %v2713_v60, 2  ;;  %v3132_v15 = vadd.s32 3, %v3128_v62 }
 0x4e6   : > { %v3766_v57 = vrot.slane %v3299_v61, 10 }
 0x4e7   : > { %v3748_v42 = vmin.u32 %v3105_v25, %v3103_v3  ;;  %v3133_v18 = vand.u32 3, %v3132_v15 }
 0x4e9   : > { %v3107_v17 = vclz %v3748_v42  ;;  %vm3138_vm11 = vcmp.eq.s32.totalorder %v3133_v18, 2  ;;  %vm3135_vm12 = vcmp.eq.s32.totalorder %v3133_v18, 0  ;;  %vm3134_vm13 = vcmp.lt.s32.totalorder %v3133_v18, 2 }
 0x4eb   : > { %v3749_v49 = vadd.s32 4294967294, %v3107_v17 }
 0x4ed   : > { %vm3750_vm4 = vcmp.lt.s32.totalorder %v3749_v49, 0  ;;  %v4286_v11 = vpop.eup %4285 }
 0x4ee   : > { %v3110_v40 = vsel %vm3750_vm4, 0, %v3749_v49  ;;  %v4288_v56 = vpop.eup %4287  ;;  %v2719_v37 = vxor.u32 2147483648, %v4286_v11 }
 0x4ef   : > { %v3111_v1 = vsub.s32 32, %v3110_v40  ;;  %v3112_v28 = vshll.u32 %v3103_v3, %v3110_v40  ;;  %v3115_v13 = vsub.s32 4294967266, %v3110_v40  ;;  %v2716_v36 = vxor.u32 2147483648, %v4288_v56  ;;  %v4290_v26 = vpop.eup %4289 }
 0x4f0   : > { %v2720_v52 = vsel %vm2718_vm8, %v2719_v37, %v4288_v56  ;;  %v3319_v59 = vmul.f32 %v4290_v26, %v3762_v29 }
 0x4f1   : > { %v3113_v44 = vshrl.u32 %v3095_v20, %v3111_v1  ;;  %v3116_v47 = vadd.s32 127, %v3115_v13  ;;  %v2717_v19 = vsel %vm2715_vm7, %v4286_v11, %v2716_v36 }
 0x4f2   : > { %v2721_v53 = vsel %vm2714_vm9, %v2717_v19, %v2720_v52  ;;  %v3335_v6 = vmul.f32 %v3766_v57, %v3319_v59 }
 0x4f3   : > { %v3114_v41 = vor.u32 %v3113_v44, %v3112_v28  ;;  %v3117_v58 = vshll.u32 %v3116_v47, 23  ;;  %v2722_v3 = vsel %vm2711_vm10, nan, %v2721_v53 }
 0x4f4   : > { %v3754_v34 = vrot.slane %v2722_v3, 9  ;;  %v3423_v49 = vsub.f32 1.0, %v3335_v6  ;;  %v3367_v20 = vrot.slane %v3335_v6, %v5470_v5  ;;  %v3371_v55 = vrot.slane %v3335_v6, %v5476_v22 }
 0x4f5   : > { %v3118_v48 = vor.u32 4788187, %v3117_v58  ;;  %v3121_v8 = vcvt.s32.f32 %v3114_v41 }
 0x4f6   : > { %v3162_v1 = vmul.f32 %v3754_v34, %v2722_v3  ;;  %v3455_v13 = vrot.slane %v3423_v49, %v5470_v5  ;;  %v3459_v54 = vrot.slane %v3423_v49, %v5476_v22  ;;  %v3407_v47 = vrot.slane %v3367_v20, %v5470_v5 }
 0x4f7   : > { %v3119_v24 = vand.u32 2147483647, %v3118_v48  ;;  %v3411_v32 = vrot.slane %v3371_v55, %v5470_v5 }
 0x4f8   : > { %v3218_v4 = vrot.slane %v3162_v1, %v5489_v63  ;;  %v3495_v41 = vrot.slane %v3455_v13, %v5470_v5  ;;  %v3499_v58 = vrot.slane %v3459_v54, %v5470_v5  ;;  %v3549_v5 = vrot.slane %v3541_v23, %v5520_v14 }
 0x4f9   : > { %v3122_v33 = vmul.f32 %v3121_v8, %v3119_v24  ;;  %v3418_v8 = vmul.f32 %v3407_v47, %v6038_v21  ;;  %v3419_v7 = vmul.f32 %v3411_v32, %v6044_v2 }
 0x4fb   : > { %v3123_v51 = vxor.u32 2147483648, %v3122_v33 }
 0x4fd   : > { %v3124_v35 = vsel %vm3041_vm5, %v3123_v51, %v3122_v33 }
 0x4fe   : > { %v3127_v9 = vsel %vm6071_vm6, %v5817_v31, %v3124_v35  ;;  %v3214_v31 = vrot.slane %v3162_v1, %v5483_v45 }
 0x4ff   : > { %4291 = vcosq.f32 %v3127_v9 }
 0x500   : > { %4293 = vsinq.f32 %v3127_v9 }
 0x509   : > { %v4292_v25 = vpop.eup %4291 }
 0x50a   : > { %v4294_v42 = vpop.eup %4293  ;;  %v3139_v30 = vxor.u32 2147483648, %v4292_v25 }
 0x50b   : > { %v3136_v17 = vxor.u32 2147483648, %v4294_v42 }
 0x50c   : > { %v3140_v27 = vsel %vm3138_vm11, %v3139_v30, %v4294_v42 }
 0x50d   : > { %v3137_v50 = vsel %vm3135_vm12, %v4292_v25, %v3136_v17 }
 0x50e   : > { %v3141_v40 = vsel %vm3134_vm13, %v3137_v50, %v3140_v27 }
 0x50f   : > { %v3142_v28 = vsel %vm3131_vm14, nan, %v3141_v40 }
 0x510   : > { %v3758_v44 = vrot.slane %v3142_v28, 9 }
 0x512   : > { %v3182_v12 = vmul.f32 %v3758_v44, %v3142_v28 }
 0x514   : > { %v3258_v48 = vrot.slane %v3182_v12, %v5483_v45  ;;  %v3262_v22 = vrot.slane %v3182_v12, %v5489_v63 }
 0x516   : > { %v3278_v24 = vsel %vm3271_vm0, %v3214_v31, %v3258_v48  ;;  %v3279_v0 = vsel %vm3271_vm0, %v3218_v4, %v3262_v22 }
 0x517   : > { %v3506_v38 = vmul.f32 %v3495_v41, %v3278_v24  ;;  %v3507_v46 = vmul.f32 %v3499_v58, %v3279_v0 }
 0x519   : > { %v3514_v11 = vadd.f32 %v3506_v38, %v3418_v8  ;;  %v3515_v33 = vadd.f32 %v3507_v46, %v3419_v7 }
 0x51b   : > { %v3542_v45 = vcombine.low %v3514_v11, %v3515_v33 }
 0x51d   : > { %v3556_v63 = vrot.slane %v3542_v45, %v5520_v14 }
 0x51f   : > { %v3557_v21 = vcombine.low %v3549_v5, %v3556_v63 }
 0x521   : > { %3561 = vst [vmem:[%s6034_s16 + $0x8] sm:$0xff] %v3557_v21 }
 0x522   : > { %4316 = shalt.err (!%p4313_p3)
}
 0x523   : > { %s4317_s10 = scalar_lea.hbm %s6108_s30, 256  ;;  %s4321_s13 = scalar_lea.hbm %s6158_s5, 512 }
 0x524   : > { %p4318_p4 = scmp.ne.s32.totalorder %s6108_s30, %s4317_s10  ;;  %p4322_p9 = scmp.lt.u32.totalorder %s6108_s30, %s6158_s5 }
 0x525   : > { %p4323_p10 = scmp.lt.u32.totalorder %s4321_s13, %s4317_s10  ;;  %p4325_p12 = scmp.lt.u32.totalorder %s4317_s10, %s6108_s30 }
 0x526   : > { %p4319_p7 = pnand %p4318_p4, %p4449_p5 }
 0x527   : > { %p4324_p11 = por %p4323_p10, %p4322_p9 }
 0x528   : > { %p4320_p8 = pneg %p4319_p7 }
 0x529   : > { %p4326_p13 = por %p4325_p12, %p4324_p11 }
 0x52b   : > { %p4327_p0 = pnand %p4326_p13, %p4320_p8 }
 0x52d   : > { %4330 = shalt.err (!%p4327_p0)
}
 0x52e   : > { %3933 = dma.vmem_to_hbm [thread:$0]  (%p4449_p5), %s6110_s23, 256, %s6108_s30, %s3563_s6  }
 0x52f PF: > { %p3939_p1 = scmp.ge.s32.totalorder %s4365_s21, 2  ;;  %s3589_s16 = sand.u32 1, %s4353_s18  }
 0x530   : > { %s3590_s17 = scalar_lea.sflag [#allocation3], %s3589_s16 }
 0x531   : > { %p3936_p2 = pnand %p3939_p1, %p4453_p6 }
 0x533   : > { %4348 = dma.done.wait (!%p3936_p2), %s3590_s17, 256  }
 0x534   : > { %4350 = vsyncadd (!%p3936_p2), %s3590_s17, 4294967040  ;;  %p15_p3 = scmp.ge.s32.totalorder %s4436_s24, 4   ;;  %s6192_s18 = smov %s4357_s19 }
 0x535   : > { %s6193_s19 = smov %s4361_s20  ;;  %s6194_s20 = smov %s4447_s27 }
 0x536   : > { %s6195_s21 = smov %s4436_s24  ;;  %17 = sbr.rel (!%p15_p3) target bundleno = 3 (0x3), region = 75 }
 0x53d   :  { %3595 = vsyncpa [#allocation3], 1 }
 0x53e   :  { %3597 = vsyncpa [#allocation3 + $0x1], 1 }

</bundles_post_ra>
